<compile_context>
chip_gen: v5e
topology: v5e:2x2
jax: 0.10.0
libtpu: 0.0.40
codegen_flags: <defaults>
</compile_context>

<pallas_src>
import functools

import jax
import jax.numpy as jnp
from jax.experimental import pallas as pl
from jax.experimental.pallas import tpu as pltpu

NEG_SLOPE = 0.01   # F.leaky_relu default negative_slope
FEAT = 10          # raw feature width: col 0 = goal, cols 1:10 = pos
FEAT_PAD = 16      # lane-padded feature width fed to the kernel
HID = 256          # fused hidden lane width ( [goal 0:128 | pos 128:256] )
W_ROWS = 664       # packed weight-slab rows (all segments 8-row aligned)

_SINGLE_BUFFER_WEIGHTS_OK = None   # memo: does this runtime accept Buffered(1)?


def _lrelu(x):
    return jnp.where(x > 0, x, NEG_SLOPE * x)


def _round_up(x, m):
    return (x + m - 1) // m * m


def _is_v5e():
    try:
        kind = jax.devices()[0].device_kind.lower()
    except Exception:
        return False
    return ("v5 lite" in kind) or ("v5e" in kind) or ("v5litepod" in kind)


# ------------------------------------------------------------------ kernel --
def reward_kernel(tlen_ref, x_ref, wp_ref, bp_ref, out_ref, *, split_layer2):
    """One fused row-tile (both trajectories) through the MLP.

    tlen_ref : SMEM (2,) int32      -- valid step counts [T_i, T_j]
    x_ref    : VMEM (2R, 16) f32    -- rows 0:R = traj_i tile, R:2R = traj_j tile
    wp_ref   : VMEM (664, 256) f32  -- packed weights (resident, constant index)
    bp_ref   : VMEM (8, 256) f32    -- packed biases  (resident, constant index)
    out_ref  : VMEM (1, 128) f32    -- lane0 = sum r_i, lane1 = sum r_j,
                                       lane2 = sum|r_i| + sum|r_j|
    """
    rt = pl.program_id(0)

    @pl.when(rt == 0)
    def _init():
        out_ref[...] = jnp.zeros_like(out_ref)

    two_r = x_ref.shape[0]
    rows = two_r // 2
    x = x_ref[...]                                     # (2R, 16)

    b1 = bp_ref[0:1, :]
    b2 = bp_ref[1:2, :]
    b3 = bp_ref[2:3, 0:128]
    b4 = bp_ref[3:4, 0:128]
    b5 = bp_ref[4:5, 0:1]                              # fc3 bias scalar (1,1)

    # Layer 1 (fused goal_fc1 / pos_fc1): (2R,16) x (16,256)
    h1 = _lrelu(jnp.dot(x, wp_ref[0:16, :],
                        preferred_element_type=jnp.float32) + b1)

    if split_layer2:
        # v5e path: 128x128 matmuls only (4x128^2 MXU); no zero weight tiles.
        h2g = _lrelu(jnp.dot(h1[:, 0:128], wp_ref[16:144, 0:128],
                             preferred_element_type=jnp.float32) + b2[:, 0:128])
        h2p = _lrelu(jnp.dot(h1[:, 128:256], wp_ref[144:272, 128:256],
                             preferred_element_type=jnp.float32) + b2[:, 128:256])
        h3 = _lrelu(jnp.dot(h2g, wp_ref[272:400, 0:128],
                            preferred_element_type=jnp.float32)
                    + jnp.dot(h2p, wp_ref[400:528, 0:128],
                              preferred_element_type=jnp.float32)
                    + b3)
    else:
        # v6e/v7x path: fused block-diagonal layer 2, single 256-wide pass.
        h2 = _lrelu(jnp.dot(h1, wp_ref[16:272, :],
                            preferred_element_type=jnp.float32) + b2)
        # fc1 (256 -> 128): only the live 128 output lanes.
        h3 = _lrelu(jnp.dot(h2, wp_ref[272:528, 0:128],
                            preferred_element_type=jnp.float32) + b3)

    # fc2 (128 -> 64, lane-padded to 128; lanes 64:128 stay exactly zero).
    h4 = _lrelu(jnp.dot(h3, wp_ref[528:656, 0:128],
                        preferred_element_type=jnp.float32) + b4)
    # fc3 (64 -> 1): VPU broadcast-mul + XLU lane reduce, no MXU trip.
    w5 = wp_ref[656:657, 0:128]
    r = _lrelu(jnp.sum(h4 * w5, axis=-1, keepdims=True) + b5)        # (2R, 1)

    # Per-trajectory masked sums (padded rows excluded before summing).
    row = jax.lax.broadcasted_iota(jnp.int32, (two_r, 1), 0)
    is_i = row < rows
    grow = jnp.where(is_i, row, row - rows) + rt * rows
    vi = jnp.logical_and(is_i, grow < tlen_ref[0]).astype(jnp.float32)
    vj = jnp.logical_and(jnp.logical_not(is_i), grow < tlen_ref[1]).astype(jnp.float32)

    si = jnp.sum(r * vi, keepdims=True)
    sj = jnp.sum(r * vj, keepdims=True)
    sa = jnp.sum(jnp.abs(r) * (vi + vj), keepdims=True)

    lane = jax.lax.broadcasted_iota(jnp.int32, (1, 128), 1)
    upd = (jnp.where(lane == 0, si, 0.0)
           + jnp.where(lane == 1, sj, 0.0)
           + jnp.where(lane == 2, sa, 0.0))
    out_ref[...] = out_ref[...] + upd


# --------------------------------------------------------------- packing ----
def pack_params(params):
    """Pack the 7 layers into one lane-dense weight slab + one bias slab."""
    wp = jnp.zeros((W_ROWS, HID), jnp.float32)
    # layer 1 (fused): input col 0 -> goal lanes 0:128, cols 1:10 -> pos lanes.
    wp = wp.at[0, 0:128].set(params["goal_fc1_w"][0])
    wp = wp.at[1:10, 128:256].set(params["pos_fc1_w"])
    # layer 2 (block diagonal).
    wp = wp.at[16:144, 0:128].set(params["goal_fc2_w"])
    wp = wp.at[144:272, 128:256].set(params["pos_fc2_w"])
    # fc1 (256->128) / fc2 (128->64) / fc3 (64->1).
    wp = wp.at[272:528, 0:128].set(params["fc1_w"])
    wp = wp.at[528:656, 0:64].set(params["fc2_w"])
    wp = wp.at[656, 0:64].set(params["fc3_w"][:, 0])

    bp = jnp.zeros((8, HID), jnp.float32)
    bp = bp.at[0, 0:128].set(params["goal_fc1_b"])
    bp = bp.at[0, 128:256].set(params["pos_fc1_b"])
    bp = bp.at[1, 0:128].set(params["goal_fc2_b"])
    bp = bp.at[1, 128:256].set(params["pos_fc2_b"])
    bp = bp.at[2, 0:128].set(params["fc1_b"])
    bp = bp.at[3, 0:64].set(params["fc2_b"])
    bp = bp.at[4, :].set(params["fc3_b"][0])
    return wp, bp


# ----------------------------------------------------------- pallas call ----
def _call_kernel(tlen, x, wp, bp, block_rows, n_tiles, split_layer2,
                 single_buffer_weights):
    kernel = functools.partial(reward_kernel, split_layer2=split_layer2)

    def const_spec(shape):
        if single_buffer_weights:
            # Resident slab, constant index_map -> one buffer is enough.
            return pl.BlockSpec(shape, lambda r, tl: (0, 0),
                                pipeline_mode=pl.Buffered(1))
        return pl.BlockSpec(shape, lambda r, tl: (0, 0))

    return pl.pallas_call(
        kernel,
        out_shape=jax.ShapeDtypeStruct((1, 128), jnp.float32),
        grid_spec=pltpu.PrefetchScalarGridSpec(
            num_scalar_prefetch=1,
            grid=(n_tiles,),
            in_specs=[
                pl.BlockSpec((2 * block_rows, FEAT_PAD), lambda r, tl: (r, 0)),
                const_spec((W_ROWS, HID)),
                const_spec((8, HID)),
            ],
            out_specs=pl.BlockSpec((1, 128), lambda r, tl: (0, 0)),
        ),
        compiler_params=pltpu.CompilerParams(
            dimension_semantics=("arbitrary",)),
    )(tlen, x, wp, bp)


# --------------------------------------------------------------- wrapper ----
def reward_net_forward(traj_i, traj_j, params, *, split_layer2=None,
                       block_cap=None):
    """Equivalent of RewardNet2.forward(traj_i, traj_j).

    Returns (logits, abs_sum): logits (2,) = [cum_r_i, cum_r_j],
    abs_sum () = abs_r_i + abs_r_j.
    """
    global _SINGLE_BUFFER_WEIGHTS_OK

    t_i, f_i = traj_i.shape
    t_j, f_j = traj_j.shape
    assert f_i == FEAT and f_j == FEAT

    v5e = _is_v5e()
    if split_layer2 is None:
        split_layer2 = v5e                       # 128-wide MXU on v5e
    if block_cap is None:
        block_cap = 1024 if v5e else 2048        # v5e: 16 MiB default scoped VMEM

    max_t = max(t_i, t_j)
    block_rows = min(block_cap, _round_up(max_t, 8))
    t_pad = _round_up(max_t, block_rows)
    n_tiles = t_pad // block_rows

    def pad(t):
        buf = jnp.zeros((t_pad, FEAT_PAD), jnp.float32)
        return buf.at[: t.shape[0], :FEAT].set(t.astype(jnp.float32))

    # Interleave padded row-blocks of the two trajectories so each grid step
    # feeds ONE (2*block_rows, 16) tile through a single fused MLP pass
    # (amortizes every MXU weight push over both trajectories).
    ti = pad(traj_i).reshape(n_tiles, block_rows, FEAT_PAD)
    tj = pad(traj_j).reshape(n_tiles, block_rows, FEAT_PAD)
    x = jnp.concatenate([ti, tj], axis=1).reshape(2 * t_pad, FEAT_PAD)

    wp, bp = pack_params(params)
    tlen = jnp.array([t_i, t_j], jnp.int32)

    if _SINGLE_BUFFER_WEIGHTS_OK is not False:
        try:
            out = _call_kernel(tlen, x, wp, bp, block_rows, n_tiles,
                               split_layer2, single_buffer_weights=True)
            out = jax.block_until_ready(out)
            _SINGLE_BUFFER_WEIGHTS_OK = True
            return out[0, :2], out[0, 2]
        except Exception:
            # Runtime without single-buffered resident operands: fall back to
            # the default double-buffered (and previously validated) spec.
            _SINGLE_BUFFER_WEIGHTS_OK = False

    out = _call_kernel(tlen, x, wp, bp, block_rows, n_tiles,
                       split_layer2, single_buffer_weights=False)
    out = jax.block_until_ready(out)
    return out[0, :2], out[0, 2]


# ------------------------------------------------------------- reference ----
def init_params(key):
    """Synthetic init mimicking nn.Linear's U(-1/sqrt(fan_in), 1/sqrt(fan_in)).
    Weights stored as (in, out) = transpose of PyTorch's (out, in)."""
    dims = {
        "goal_fc1": (1, 128), "goal_fc2": (128, 128),
        "pos_fc1": (9, 128), "pos_fc2": (128, 128),
        "fc1": (256, 128), "fc2": (128, 64), "fc3": (64, 1),
    }
    params = {}
    for name, (fan_in, fan_out) in dims.items():
        key, kw, kb = jax.random.split(key, 3)
        bound = 1.0 / float(fan_in) ** 0.5
        params[f"{name}_w"] = jax.random.uniform(
            kw, (fan_in, fan_out), jnp.float32, minval=-bound, maxval=bound)
        params[f"{name}_b"] = jax.random.uniform(
            kb, (fan_out,), jnp.float32, minval=-bound, maxval=bound)
    return params


def ref_forward(traj_i, traj_j, params):
    """Pure-JAX transcription of RewardNet2.forward for correctness checks."""
    def cum_return(traj):
        g = traj[:, 0:1]
        g = _lrelu(g @ params["goal_fc1_w"] + params["goal_fc1_b"])
        g = _lrelu(g @ params["goal_fc2_w"] + params["goal_fc2_b"])
        pos = traj[:, 1:10]
        pos = _lrelu(pos @ params["pos_fc1_w"] + params["pos_fc1_b"])
        pos = _lrelu(pos @ params["pos_fc2_w"] + params["pos_fc2_b"])
        x = jnp.concatenate([g, pos], axis=1)
        x = _lrelu(x @ params["fc1_w"] + params["fc1_b"])
        x = _lrelu(x @ params["fc2_w"] + params["fc2_b"])
        r = _lrelu(x @ params["fc3_w"] + params["fc3_b"])
        return jnp.sum(r), jnp.sum(jnp.abs(r))

    ci, ai = cum_return(traj_i)
    cj, aj = cum_return(traj_j)
    return jnp.stack([ci, cj]), ai + aj


if __name__ == "__main__":
    key = jax.random.PRNGKey(0)
    k_params, k_i, k_j, k_i2, k_j2 = jax.random.split(key, 5)
    params = init_params(k_params)

    # Small shapes consistent with the module: trajectories of (seq, 10).
    T = 8
    traj_i = jax.random.normal(k_i, (T, FEAT), jnp.float32)
    traj_j = jax.random.normal(k_j, (T, FEAT), jnp.float32)
    ref_logits, ref_abs = ref_forward(traj_i, traj_j, params)

    # Default (auto chip-dispatch) path.
    logits, abs_sum = reward_net_forward(traj_i, traj_j, params)
    logits = jax.block_until_ready(logits)
    abs_sum = jax.block_until_ready(abs_sum)
    assert jnp.allclose(logits, ref_logits, rtol=1e-4, atol=1e-4), (logits, ref_logits)
    assert jnp.allclose(abs_sum, ref_abs, rtol=1e-4, atol=1e-4), (abs_sum, ref_abs)

    # Exercise both layer-2 code paths (fused 256-wide and v5e-style 128x128 split).
    for split in (False, True):
        lg, ab = reward_net_forward(traj_i, traj_j, params, split_layer2=split)
        lg = jax.block_until_ready(lg)
        ab = jax.block_until_ready(ab)
        assert jnp.allclose(lg, ref_logits, rtol=1e-4, atol=1e-4), (split, lg, ref_logits)
        assert jnp.allclose(ab, ref_abs, rtol=1e-4, atol=1e-4), (split, ab, ref_abs)

    # Ragged / padded path: different lengths, non-multiple-of-8 rows.
    traj_i2 = jax.random.normal(k_i2, (20, FEAT), jnp.float32)
    traj_j2 = jax.random.normal(k_j2, (13, FEAT), jnp.float32)
    logits2, abs2 = reward_net_forward(traj_i2, traj_j2, params)
    logits2 = jax.block_until_ready(logits2)
    abs2 = jax.block_until_ready(abs2)
    ref_logits2, ref_abs2 = ref_forward(traj_i2, traj_j2, params)
    assert jnp.allclose(logits2, ref_logits2, rtol=1e-4, atol=1e-4), (logits2, ref_logits2)
    assert jnp.allclose(abs2, ref_abs2, rtol=1e-4, atol=1e-4), (abs2, ref_abs2)

    # Multi-tile path: small forced block cap -> several grid steps + accumulator.
    traj_i3 = jax.random.normal(k_i, (40, FEAT), jnp.float32)
    traj_j3 = jax.random.normal(k_j, (27, FEAT), jnp.float32)
    logits3, abs3 = reward_net_forward(traj_i3, traj_j3, params, block_cap=16)
    logits3 = jax.block_until_ready(logits3)
    abs3 = jax.block_until_ready(abs3)
    ref_logits3, ref_abs3 = ref_forward(traj_i3, traj_j3, params)
    assert jnp.allclose(logits3, ref_logits3, rtol=1e-4, atol=1e-4), (logits3, ref_logits3)
    assert jnp.allclose(abs3, ref_abs3, rtol=1e-4, atol=1e-4), (abs3, ref_abs3)

    print("KERNEL_OK")
</pallas_src>

<mosaic_0001>
module attributes {stable_mosaic.version = 11 : i64} {
  func.func @reward_kernel(%arg0: i32, %arg1: memref<2xi32, #tpu.memory_space<smem>>, %arg2: memref<16x16xf32, #tpu.memory_space<vmem>>, %arg3: memref<664x256xf32, #tpu.memory_space<vmem>>, %arg4: memref<8x256xf32, #tpu.memory_space<vmem>>, %arg5: memref<1x128xf32, #tpu.memory_space<vmem>>) attributes {dimension_semantics = [#tpu.dimension_semantics<arbitrary>], iteration_bounds = array<i64: 1>, scalar_prefetch = 1 : i64, scratch_operands = 0 : i64, tpu.core_type = #tpu.core_type<tc>, window_params = [{transform_indices = @transform_0, window_bounds = array<i64: 16, 16>}, {pipeline_mode = #tpu.pipeline_mode<synchronous>, transform_indices = @transform_1, window_bounds = array<i64: 664, 256>}, {pipeline_mode = #tpu.pipeline_mode<synchronous>, transform_indices = @transform_2, window_bounds = array<i64: 8, 256>}, {pipeline_mode = #tpu.pipeline_mode<synchronous>, transform_indices = @transform_3, window_bounds = array<i64: 1, 128>}]} {
    %c0_i32 = arith.constant 0 : i32
    %0 = arith.cmpi eq, %arg0, %c0_i32 : i32
    %1 = arith.extui %0 : i1 to i32
    %c0_i32_0 = arith.constant 0 : i32
    %2 = arith.cmpi ne, %1, %c0_i32_0 : i32
    scf.if %2 {
      %cst_44 = arith.constant 0.000000e+00 : f32
      %123 = vector.broadcast %cst_44 : f32 to vector<1x128xf32>
      %c0_45 = arith.constant 0 : index
      %c0_46 = arith.constant 0 : index
      %124 = vector.load %arg5[%c0_45, %c0_46] : memref<1x128xf32, #tpu.memory_space<vmem>>, vector<1x128xf32>
      tpu.vector_store %arg5[%c0_45, %c0_46], %123 {strides = array<i32>} : memref<1x128xf32, #tpu.memory_space<vmem>>, vector<1x128xf32>,
    } else {
    }
    %c0 = arith.constant 0 : index
    %c0_1 = arith.constant 0 : index
    %3 = vector.load %arg2[%c0, %c0_1] : memref<16x16xf32, #tpu.memory_space<vmem>>, vector<16x16xf32>
    %c0_2 = arith.constant 0 : index
    %c0_3 = arith.constant 0 : index
    %4 = vector.load %arg4[%c0_2, %c0_3] : memref<8x256xf32, #tpu.memory_space<vmem>>, vector<1x256xf32>
    %c1 = arith.constant 1 : index
    %c0_4 = arith.constant 0 : index
    %5 = vector.load %arg4[%c1, %c0_4] : memref<8x256xf32, #tpu.memory_space<vmem>>, vector<1x256xf32>
    %c2 = arith.constant 2 : index
    %c0_5 = arith.constant 0 : index
    %6 = vector.load %arg4[%c2, %c0_5] : memref<8x256xf32, #tpu.memory_space<vmem>>, vector<1x128xf32>
    %c3 = arith.constant 3 : index
    %c0_6 = arith.constant 0 : index
    %7 = vector.load %arg4[%c3, %c0_6] : memref<8x256xf32, #tpu.memory_space<vmem>>, vector<1x128xf32>
    %c4 = arith.constant 4 : index
    %c0_7 = arith.constant 0 : index
    %8 = vector.load %arg4[%c4, %c0_7] : memref<8x256xf32, #tpu.memory_space<vmem>>, vector<1x1xf32>
    %c0_8 = arith.constant 0 : index
    %c0_9 = arith.constant 0 : index
    %9 = vector.load %arg3[%c0_8, %c0_9] : memref<664x256xf32, #tpu.memory_space<vmem>>, vector<16x256xf32>
    %cst = arith.constant dense<0.000000e+00> : vector<16x256xf32>
    %10 = tpu.matmul %3, %9, %cst {dimension_numbers = #tpu.dot_dimension_numbers<[1], [0], [0], [1], [0, 0, 1, 1], [], []>} : vector<16x16xf32>, vector<16x256xf32>, vector<16x256xf32> -> vector<16x256xf32>
    %11 = vector.broadcast %4 : vector<1x256xf32> to vector<16x256xf32>
    %12 = arith.addf %10, %11 : vector<16x256xf32>
    %cst_10 = arith.constant 0.000000e+00 : f32
    %13 = vector.broadcast %cst_10 : f32 to vector<16x256xf32>
    %14 = arith.cmpf ogt, %12, %13 : vector<16x256xf32>
    %cst_11 = arith.constant 0.00999999977 : f32
    %15 = vector.broadcast %cst_11 : f32 to vector<16x256xf32>
    %16 = arith.mulf %15, %12 : vector<16x256xf32>
    %17 = arith.select %14, %12, %16 : vector<16x256xi1>, vector<16x256xf32>
    %c16 = arith.constant 16 : index
    %c0_12 = arith.constant 0 : index
    %18 = vector.load %arg3[%c16, %c0_12] : memref<664x256xf32, #tpu.memory_space<vmem>>, vector<256x256xf32>
    %cst_13 = arith.constant dense<0.000000e+00> : vector<16x256xf32>
    %19 = tpu.matmul %17, %18, %cst_13 {dimension_numbers = #tpu.dot_dimension_numbers<[1], [0], [0], [1], [0, 0, 1, 1], [], []>} : vector<16x256xf32>, vector<256x256xf32>, vector<16x256xf32> -> vector<16x256xf32>
    %20 = vector.broadcast %5 : vector<1x256xf32> to vector<16x256xf32>
    %21 = arith.addf %19, %20 : vector<16x256xf32>
    %cst_14 = arith.constant 0.000000e+00 : f32
    %22 = vector.broadcast %cst_14 : f32 to vector<16x256xf32>
    %23 = arith.cmpf ogt, %21, %22 : vector<16x256xf32>
    %cst_15 = arith.constant 0.00999999977 : f32
    %24 = vector.broadcast %cst_15 : f32 to vector<16x256xf32>
    %25 = arith.mulf %24, %21 : vector<16x256xf32>
    %26 = arith.select %23, %21, %25 : vector<16x256xi1>, vector<16x256xf32>
    %c272 = arith.constant 272 : index
    %c0_16 = arith.constant 0 : index
    %27 = vector.load %arg3[%c272, %c0_16] : memref<664x256xf32, #tpu.memory_space<vmem>>, vector<256x128xf32>
    %cst_17 = arith.constant dense<0.000000e+00> : vector<16x128xf32>
    %28 = tpu.matmul %26, %27, %cst_17 {dimension_numbers = #tpu.dot_dimension_numbers<[1], [0], [0], [1], [0, 0, 1, 1], [], []>} : vector<16x256xf32>, vector<256x128xf32>, vector<16x128xf32> -> vector<16x128xf32>
    %29 = vector.broadcast %6 : vector<1x128xf32> to vector<16x128xf32>
    %30 = arith.addf %28, %29 : vector<16x128xf32>
    %cst_18 = arith.constant 0.000000e+00 : f32
    %31 = vector.broadcast %cst_18 : f32 to vector<16x128xf32>
    %32 = arith.cmpf ogt, %30, %31 : vector<16x128xf32>
    %cst_19 = arith.constant 0.00999999977 : f32
    %33 = vector.broadcast %cst_19 : f32 to vector<16x128xf32>
    %34 = arith.mulf %33, %30 : vector<16x128xf32>
    %35 = arith.select %32, %30, %34 : vector<16x128xi1>, vector<16x128xf32>
    %c528 = arith.constant 528 : index
    %c0_20 = arith.constant 0 : index
    %36 = vector.load %arg3[%c528, %c0_20] : memref<664x256xf32, #tpu.memory_space<vmem>>, vector<128x128xf32>
    %cst_21 = arith.constant dense<0.000000e+00> : vector<16x128xf32>
    %37 = tpu.matmul %35, %36, %cst_21 {dimension_numbers = #tpu.dot_dimension_numbers<[1], [0], [0], [1], [0, 0, 1, 1], [], []>} : vector<16x128xf32>, vector<128x128xf32>, vector<16x128xf32> -> vector<16x128xf32>
    %38 = vector.broadcast %7 : vector<1x128xf32> to vector<16x128xf32>
    %39 = arith.addf %37, %38 : vector<16x128xf32>
    %cst_22 = arith.constant 0.000000e+00 : f32
    %40 = vector.broadcast %cst_22 : f32 to vector<16x128xf32>
    %41 = arith.cmpf ogt, %39, %40 : vector<16x128xf32>
    %cst_23 = arith.constant 0.00999999977 : f32
    %42 = vector.broadcast %cst_23 : f32 to vector<16x128xf32>
    %43 = arith.mulf %42, %39 : vector<16x128xf32>
    %44 = arith.select %41, %39, %43 : vector<16x128xi1>, vector<16x128xf32>
    %c656 = arith.constant 656 : index
    %c0_24 = arith.constant 0 : index
    %45 = vector.load %arg3[%c656, %c0_24] : memref<664x256xf32, #tpu.memory_space<vmem>>, vector<1x128xf32>
    %46 = vector.broadcast %45 : vector<1x128xf32> to vector<16x128xf32>
    %47 = arith.mulf %44, %46 : vector<16x128xf32>
    %cst_25 = arith.constant dense<0.000000e+00> : vector<16xf32>
    %48 = vector.multi_reduction <add>, %47, %cst_25 [1] : vector<16x128xf32> to vector<16xf32>
    %49 = vector.shape_cast %48 : vector<16xf32> to vector<16x1xf32>
    %50 = vector.broadcast %8 : vector<1x1xf32> to vector<16x1xf32>
    %51 = arith.addf %49, %50 : vector<16x1xf32>
    %cst_26 = arith.constant 0.000000e+00 : f32
    %52 = vector.broadcast %cst_26 : f32 to vector<16x1xf32>
    %53 = arith.cmpf ogt, %51, %52 : vector<16x1xf32>
    %cst_27 = arith.constant 0.00999999977 : f32
    %54 = vector.broadcast %cst_27 : f32 to vector<16x1xf32>
    %55 = arith.mulf %54, %51 : vector<16x1xf32>
    %56 = arith.select %53, %51, %55 : vector<16x1xi1>, vector<16x1xf32>
    %57 = tpu.iota {dimensions = array<i32: 0>} : vector<16x1xi32>
    %c8_i32 = arith.constant 8 : i32
    %58 = vector.broadcast %c8_i32 : i32 to vector<16x1xi32>
    %59 = arith.cmpi slt, %57, %58 : vector<16x1xi32>
    %c8_i32_28 = arith.constant 8 : i32
    %60 = vector.broadcast %c8_i32_28 : i32 to vector<16x1xi32>
    %61 = arith.subi %57, %60 : vector<16x1xi32>
    %62 = arith.select %59, %57, %61 : vector<16x1xi1>, vector<16x1xi32>
    %c8_i32_29 = arith.constant 8 : i32
    %63 = arith.muli %arg0, %c8_i32_29 : i32
    %64 = vector.broadcast %63 : i32 to vector<16x1xi32>
    %65 = arith.addi %62, %64 : vector<16x1xi32>
    %c0_30 = arith.constant 0 : index
    %66 = memref.load %arg1[%c0_30] : memref<2xi32, #tpu.memory_space<smem>>
    %67 = vector.broadcast %66 : i32 to vector<16x1xi32>
    %68 = arith.cmpi slt, %65, %67 : vector<16x1xi32>
    %69 = arith.andi %59, %68 : vector<16x1xi1>
    %70 = arith.extui %69 : vector<16x1xi1> to vector<16x1xi32>
    %71 = arith.sitofp %70 : vector<16x1xi32> to vector<16x1xf32>
    %cst_31 = arith.constant dense<true> : vector<16x1xi1>
    %72 = arith.xori %59, %cst_31 : vector<16x1xi1>
    %c1_32 = arith.constant 1 : index
    %73 = memref.load %arg1[%c1_32] : memref<2xi32, #tpu.memory_space<smem>>
    %74 = vector.broadcast %73 : i32 to vector<16x1xi32>
    %75 = arith.cmpi slt, %65, %74 : vector<16x1xi32>
    %76 = arith.andi %72, %75 : vector<16x1xi1>
    %77 = arith.extui %76 : vector<16x1xi1> to vector<16x1xi32>
    %78 = arith.sitofp %77 : vector<16x1xi32> to vector<16x1xf32>
    %79 = arith.mulf %56, %71 : vector<16x1xf32>
    %80 = vector.shape_cast %79 : vector<16x1xf32> to vector<1x16x1xf32>
    %cst_33 = arith.constant dense<0.000000e+00> : vector<1xf32>
    %81 = vector.multi_reduction <add>, %80, %cst_33 [1, 2] : vector<1x16x1xf32> to vector<1xf32>
    %82 = vector.shape_cast %81 : vector<1xf32> to vector<1x1x1xf32>
    %83 = vector.extract %82[0, 0, 0] : f32 from vector<1x1x1xf32>
    %84 = vector.broadcast %83 : f32 to vector<1x1xf32>
    %85 = arith.mulf %56, %78 : vector<16x1xf32>
    %86 = vector.shape_cast %85 : vector<16x1xf32> to vector<1x16x1xf32>
    %cst_34 = arith.constant dense<0.000000e+00> : vector<1xf32>
    %87 = vector.multi_reduction <add>, %86, %cst_34 [1, 2] : vector<1x16x1xf32> to vector<1xf32>
    %88 = vector.shape_cast %87 : vector<1xf32> to vector<1x1x1xf32>
    %89 = vector.extract %88[0, 0, 0] : f32 from vector<1x1x1xf32>
    %90 = vector.broadcast %89 : f32 to vector<1x1xf32>
    %91 = math.absf %56 : vector<16x1xf32>
    %92 = arith.addf %71, %78 : vector<16x1xf32>
    %93 = arith.mulf %91, %92 : vector<16x1xf32>
    %94 = vector.shape_cast %93 : vector<16x1xf32> to vector<1x16x1xf32>
    %cst_35 = arith.constant dense<0.000000e+00> : vector<1xf32>
    %95 = vector.multi_reduction <add>, %94, %cst_35 [1, 2] : vector<1x16x1xf32> to vector<1xf32>
    %96 = vector.shape_cast %95 : vector<1xf32> to vector<1x1x1xf32>
    %97 = vector.extract %96[0, 0, 0] : f32 from vector<1x1x1xf32>
    %98 = vector.broadcast %97 : f32 to vector<1x1xf32>
    %99 = tpu.iota {dimensions = array<i32: 1>} : vector<1x128xi32>
    %c0_i32_36 = arith.constant 0 : i32
    %100 = vector.broadcast %c0_i32_36 : i32 to vector<1x128xi32>
    %101 = arith.cmpi eq, %99, %100 : vector<1x128xi32>
    %cst_37 = arith.constant 0.000000e+00 : f32
    %102 = vector.shape_cast %84 : vector<1x1xf32> to vector<1x1xf32>
    %103 = vector.broadcast %102 : vector<1x1xf32> to vector<1x128xf32>
    %104 = vector.broadcast %cst_37 : f32 to vector<1x128xf32>
    %105 = arith.select %101, %103, %104 : vector<1x128xi1>, vector<1x128xf32>
    %c1_i32 = arith.constant 1 : i32
    %106 = vector.broadcast %c1_i32 : i32 to vector<1x128xi32>
    %107 = arith.cmpi eq, %99, %106 : vector<1x128xi32>
    %cst_38 = arith.constant 0.000000e+00 : f32
    %108 = vector.shape_cast %90 : vector<1x1xf32> to vector<1x1xf32>
    %109 = vector.broadcast %108 : vector<1x1xf32> to vector<1x128xf32>
    %110 = vector.broadcast %cst_38 : f32 to vector<1x128xf32>
    %111 = arith.select %107, %109, %110 : vector<1x128xi1>, vector<1x128xf32>
    %112 = arith.addf %105, %111 : vector<1x128xf32>
    %c2_i32 = arith.constant 2 : i32
    %113 = vector.broadcast %c2_i32 : i32 to vector<1x128xi32>
    %114 = arith.cmpi eq, %99, %113 : vector<1x128xi32>
    %cst_39 = arith.constant 0.000000e+00 : f32
    %115 = vector.shape_cast %98 : vector<1x1xf32> to vector<1x1xf32>
    %116 = vector.broadcast %115 : vector<1x1xf32> to vector<1x128xf32>
    %117 = vector.broadcast %cst_39 : f32 to vector<1x128xf32>
    %118 = arith.select %114, %116, %117 : vector<1x128xi1>, vector<1x128xf32>
    %119 = arith.addf %112, %118 : vector<1x128xf32>
    %c0_40 = arith.constant 0 : index
    %c0_41 = arith.constant 0 : index
    %120 = vector.load %arg5[%c0_40, %c0_41] : memref<1x128xf32, #tpu.memory_space<vmem>>, vector<1x128xf32>
    %121 = arith.addf %120, %119 : vector<1x128xf32>
    %c0_42 = arith.constant 0 : index
    %c0_43 = arith.constant 0 : index
    %122 = vector.load %arg5[%c0_42, %c0_43] : memref<1x128xf32, #tpu.memory_space<vmem>>, vector<1x128xf32>
    tpu.vector_store %arg5[%c0_42, %c0_43], %121 {strides = array<i32>} : memref<1x128xf32, #tpu.memory_space<vmem>>, vector<1x128xf32>,
    return
  }
  func.func @transform_0(%arg0: i32, %arg1: memref<2xi32, #tpu.memory_space<smem>>) -> (i32, i32) {
    %c0_i32 = arith.constant 0 : i32
    %c0_i32_0 = arith.constant 0 : i32
    return %arg0, %c0_i32 : i32, i32
  }
  func.func @transform_1(%arg0: i32, %arg1: memref<2xi32, #tpu.memory_space<smem>>) -> (i32, i32) {
    %c0_i32 = arith.constant 0 : i32
    %c0_i32_0 = arith.constant 0 : i32
    %c0_i32_1 = arith.constant 0 : i32
    return %c0_i32, %c0_i32_0 : i32, i32
  }
  func.func @transform_2(%arg0: i32, %arg1: memref<2xi32, #tpu.memory_space<smem>>) -> (i32, i32) {
    %c0_i32 = arith.constant 0 : i32
    %c0_i32_0 = arith.constant 0 : i32
    %c0_i32_1 = arith.constant 0 : i32
    return %c0_i32, %c0_i32_0 : i32, i32
  }
  func.func @transform_3(%arg0: i32, %arg1: memref<2xi32, #tpu.memory_space<smem>>) -> (i32, i32) {
    %c0_i32 = arith.constant 0 : i32
    %c0_i32_0 = arith.constant 0 : i32
    %c0_i32_1 = arith.constant 0 : i32
    return %c0_i32, %c0_i32_0 : i32, i32
  }
}

module attributes {stable_mosaic.version = 11 : i64} {
  func.func @reward_kernel(%arg0: i32, %arg1: memref<2xi32, #tpu.memory_space<smem>>, %arg2: memref<16x16xf32, #tpu.memory_space<vmem>>, %arg3: memref<664x256xf32, #tpu.memory_space<vmem>>, %arg4: memref<8x256xf32, #tpu.memory_space<vmem>>, %arg5: memref<1x128xf32, #tpu.memory_space<vmem>>) attributes {dimension_semantics = [#tpu.dimension_semantics<arbitrary>], iteration_bounds = array<i64: 1>, scalar_prefetch = 1 : i64, scratch_operands = 0 : i64, tpu.core_type = #tpu.core_type<tc>, window_params = [{transform_indices = @transform_0, window_bounds = array<i64: 16, 16>}, {pipeline_mode = #tpu.pipeline_mode<synchronous>, transform_indices = @transform_1, window_bounds = array<i64: 664, 256>}, {pipeline_mode = #tpu.pipeline_mode<synchronous>, transform_indices = @transform_2, window_bounds = array<i64: 8, 256>}, {pipeline_mode = #tpu.pipeline_mode<synchronous>, transform_indices = @transform_3, window_bounds = array<i64: 1, 128>}]} {
    %c0_i32 = arith.constant 0 : i32
    %0 = arith.cmpi eq, %arg0, %c0_i32 : i32
    %1 = arith.extui %0 : i1 to i32
    %c0_i32_0 = arith.constant 0 : i32
    %2 = arith.cmpi ne, %1, %c0_i32_0 : i32
    scf.if %2 {
      %cst_44 = arith.constant 0.000000e+00 : f32
      %123 = vector.broadcast %cst_44 : f32 to vector<1x128xf32>
      %c0_45 = arith.constant 0 : index
      %c0_46 = arith.constant 0 : index
      %124 = vector.load %arg5[%c0_45, %c0_46] : memref<1x128xf32, #tpu.memory_space<vmem>>, vector<1x128xf32>
      tpu.vector_store %arg5[%c0_45, %c0_46], %123 {strides = array<i32>} : memref<1x128xf32, #tpu.memory_space<vmem>>, vector<1x128xf32>,
    } else {
    }
    %c0 = arith.constant 0 : index
    %c0_1 = arith.constant 0 : index
    %3 = vector.load %arg2[%c0, %c0_1] : memref<16x16xf32, #tpu.memory_space<vmem>>, vector<16x16xf32>
    %c0_2 = arith.constant 0 : index
    %c0_3 = arith.constant 0 : index
    %4 = vector.load %arg4[%c0_2, %c0_3] : memref<8x256xf32, #tpu.memory_space<vmem>>, vector<1x256xf32>
    %c1 = arith.constant 1 : index
    %c0_4 = arith.constant 0 : index
    %5 = vector.load %arg4[%c1, %c0_4] : memref<8x256xf32, #tpu.memory_space<vmem>>, vector<1x256xf32>
    %c2 = arith.constant 2 : index
    %c0_5 = arith.constant 0 : index
    %6 = vector.load %arg4[%c2, %c0_5] : memref<8x256xf32, #tpu.memory_space<vmem>>, vector<1x128xf32>
    %c3 = arith.constant 3 : index
    %c0_6 = arith.constant 0 : index
    %7 = vector.load %arg4[%c3, %c0_6] : memref<8x256xf32, #tpu.memory_space<vmem>>, vector<1x128xf32>
    %c4 = arith.constant 4 : index
    %c0_7 = arith.constant 0 : index
    %8 = vector.load %arg4[%c4, %c0_7] : memref<8x256xf32, #tpu.memory_space<vmem>>, vector<1x1xf32>
    %c0_8 = arith.constant 0 : index
    %c0_9 = arith.constant 0 : index
    %9 = vector.load %arg3[%c0_8, %c0_9] : memref<664x256xf32, #tpu.memory_space<vmem>>, vector<16x256xf32>
    %cst = arith.constant dense<0.000000e+00> : vector<16x256xf32>
    %10 = tpu.matmul %3, %9, %cst {dimension_numbers = #tpu.dot_dimension_numbers<[1], [0], [0], [1], [0, 0, 1, 1], [], []>} : vector<16x16xf32>, vector<16x256xf32>, vector<16x256xf32> -> vector<16x256xf32>
    %11 = vector.broadcast %4 : vector<1x256xf32> to vector<16x256xf32>
    %12 = arith.addf %10, %11 : vector<16x256xf32>
    %cst_10 = arith.constant 0.000000e+00 : f32
    %13 = vector.broadcast %cst_10 : f32 to vector<16x256xf32>
    %14 = arith.cmpf ogt, %12, %13 : vector<16x256xf32>
    %cst_11 = arith.constant 0.00999999977 : f32
    %15 = vector.broadcast %cst_11 : f32 to vector<16x256xf32>
    %16 = arith.mulf %15, %12 : vector<16x256xf32>
    %17 = arith.select %14, %12, %16 : vector<16x256xi1>, vector<16x256xf32>
    %c16 = arith.constant 16 : index
    %c0_12 = arith.constant 0 : index
    %18 = vector.load %arg3[%c16, %c0_12] : memref<664x256xf32, #tpu.memory_space<vmem>>, vector<256x256xf32>
    %cst_13 = arith.constant dense<0.000000e+00> : vector<16x256xf32>
    %19 = tpu.matmul %17, %18, %cst_13 {dimension_numbers = #tpu.dot_dimension_numbers<[1], [0], [0], [1], [0, 0, 1, 1], [], []>} : vector<16x256xf32>, vector<256x256xf32>, vector<16x256xf32> -> vector<16x256xf32>
    %20 = vector.broadcast %5 : vector<1x256xf32> to vector<16x256xf32>
    %21 = arith.addf %19, %20 : vector<16x256xf32>
    %cst_14 = arith.constant 0.000000e+00 : f32
    %22 = vector.broadcast %cst_14 : f32 to vector<16x256xf32>
    %23 = arith.cmpf ogt, %21, %22 : vector<16x256xf32>
    %cst_15 = arith.constant 0.00999999977 : f32
    %24 = vector.broadcast %cst_15 : f32 to vector<16x256xf32>
    %25 = arith.mulf %24, %21 : vector<16x256xf32>
    %26 = arith.select %23, %21, %25 : vector<16x256xi1>, vector<16x256xf32>
    %c272 = arith.constant 272 : index
    %c0_16 = arith.constant 0 : index
    %27 = vector.load %arg3[%c272, %c0_16] : memref<664x256xf32, #tpu.memory_space<vmem>>, vector<256x128xf32>
    %cst_17 = arith.constant dense<0.000000e+00> : vector<16x128xf32>
    %28 = tpu.matmul %26, %27, %cst_17 {dimension_numbers = #tpu.dot_dimension_numbers<[1], [0], [0], [1], [0, 0, 1, 1], [], []>} : vector<16x256xf32>, vector<256x128xf32>, vector<16x128xf32> -> vector<16x128xf32>
    %29 = vector.broadcast %6 : vector<1x128xf32> to vector<16x128xf32>
    %30 = arith.addf %28, %29 : vector<16x128xf32>
    %cst_18 = arith.constant 0.000000e+00 : f32
    %31 = vector.broadcast %cst_18 : f32 to vector<16x128xf32>
    %32 = arith.cmpf ogt, %30, %31 : vector<16x128xf32>
    %cst_19 = arith.constant 0.00999999977 : f32
    %33 = vector.broadcast %cst_19 : f32 to vector<16x128xf32>
    %34 = arith.mulf %33, %30 : vector<16x128xf32>
    %35 = arith.select %32, %30, %34 : vector<16x128xi1>, vector<16x128xf32>
    %c528 = arith.constant 528 : index
    %c0_20 = arith.constant 0 : index
    %36 = vector.load %arg3[%c528, %c0_20] : memref<664x256xf32, #tpu.memory_space<vmem>>, vector<128x128xf32>
    %cst_21 = arith.constant dense<0.000000e+00> : vector<16x128xf32>
    %37 = tpu.matmul %35, %36, %cst_21 {dimension_numbers = #tpu.dot_dimension_numbers<[1], [0], [0], [1], [0, 0, 1, 1], [], []>} : vector<16x128xf32>, vector<128x128xf32>, vector<16x128xf32> -> vector<16x128xf32>
    %38 = vector.broadcast %7 : vector<1x128xf32> to vector<16x128xf32>
    %39 = arith.addf %37, %38 : vector<16x128xf32>
    %cst_22 = arith.constant 0.000000e+00 : f32
    %40 = vector.broadcast %cst_22 : f32 to vector<16x128xf32>
    %41 = arith.cmpf ogt, %39, %40 : vector<16x128xf32>
    %cst_23 = arith.constant 0.00999999977 : f32
    %42 = vector.broadcast %cst_23 : f32 to vector<16x128xf32>
    %43 = arith.mulf %42, %39 : vector<16x128xf32>
    %44 = arith.select %41, %39, %43 : vector<16x128xi1>, vector<16x128xf32>
    %c656 = arith.constant 656 : index
    %c0_24 = arith.constant 0 : index
    %45 = vector.load %arg3[%c656, %c0_24] : memref<664x256xf32, #tpu.memory_space<vmem>>, vector<1x128xf32>
    %46 = vector.broadcast %45 : vector<1x128xf32> to vector<16x128xf32>
    %47 = arith.mulf %44, %46 : vector<16x128xf32>
    %cst_25 = arith.constant dense<0.000000e+00> : vector<16xf32>
    %48 = vector.multi_reduction <add>, %47, %cst_25 [1] : vector<16x128xf32> to vector<16xf32>
    %49 = vector.shape_cast %48 : vector<16xf32> to vector<16x1xf32>
    %50 = vector.broadcast %8 : vector<1x1xf32> to vector<16x1xf32>
    %51 = arith.addf %49, %50 : vector<16x1xf32>
    %cst_26 = arith.constant 0.000000e+00 : f32
    %52 = vector.broadcast %cst_26 : f32 to vector<16x1xf32>
    %53 = arith.cmpf ogt, %51, %52 : vector<16x1xf32>
    %cst_27 = arith.constant 0.00999999977 : f32
    %54 = vector.broadcast %cst_27 : f32 to vector<16x1xf32>
    %55 = arith.mulf %54, %51 : vector<16x1xf32>
    %56 = arith.select %53, %51, %55 : vector<16x1xi1>, vector<16x1xf32>
    %57 = tpu.iota {dimensions = array<i32: 0>} : vector<16x1xi32>
    %c8_i32 = arith.constant 8 : i32
    %58 = vector.broadcast %c8_i32 : i32 to vector<16x1xi32>
    %59 = arith.cmpi slt, %57, %58 : vector<16x1xi32>
    %c8_i32_28 = arith.constant 8 : i32
    %60 = vector.broadcast %c8_i32_28 : i32 to vector<16x1xi32>
    %61 = arith.subi %57, %60 : vector<16x1xi32>
    %62 = arith.select %59, %57, %61 : vector<16x1xi1>, vector<16x1xi32>
    %c8_i32_29 = arith.constant 8 : i32
    %63 = arith.muli %arg0, %c8_i32_29 : i32
    %64 = vector.broadcast %63 : i32 to vector<16x1xi32>
    %65 = arith.addi %62, %64 : vector<16x1xi32>
    %c0_30 = arith.constant 0 : index
    %66 = memref.load %arg1[%c0_30] : memref<2xi32, #tpu.memory_space<smem>>
    %67 = vector.broadcast %66 : i32 to vector<16x1xi32>
    %68 = arith.cmpi slt, %65, %67 : vector<16x1xi32>
    %69 = arith.andi %59, %68 : vector<16x1xi1>
    %70 = arith.extui %69 : vector<16x1xi1> to vector<16x1xi32>
    %71 = arith.sitofp %70 : vector<16x1xi32> to vector<16x1xf32>
    %cst_31 = arith.constant dense<true> : vector<16x1xi1>
    %72 = arith.xori %59, %cst_31 : vector<16x1xi1>
    %c1_32 = arith.constant 1 : index
    %73 = memref.load %arg1[%c1_32] : memref<2xi32, #tpu.memory_space<smem>>
    %74 = vector.broadcast %73 : i32 to vector<16x1xi32>
    %75 = arith.cmpi slt, %65, %74 : vector<16x1xi32>
    %76 = arith.andi %72, %75 : vector<16x1xi1>
    %77 = arith.extui %76 : vector<16x1xi1> to vector<16x1xi32>
    %78 = arith.sitofp %77 : vector<16x1xi32> to vector<16x1xf32>
    %79 = arith.mulf %56, %71 : vector<16x1xf32>
    %80 = vector.shape_cast %79 : vector<16x1xf32> to vector<1x16x1xf32>
    %cst_33 = arith.constant dense<0.000000e+00> : vector<1xf32>
    %81 = vector.multi_reduction <add>, %80, %cst_33 [1, 2] : vector<1x16x1xf32> to vector<1xf32>
    %82 = vector.shape_cast %81 : vector<1xf32> to vector<1x1x1xf32>
    %83 = vector.extract %82[0, 0, 0] : f32 from vector<1x1x1xf32>
    %84 = vector.broadcast %83 : f32 to vector<1x1xf32>
    %85 = arith.mulf %56, %78 : vector<16x1xf32>
    %86 = vector.shape_cast %85 : vector<16x1xf32> to vector<1x16x1xf32>
    %cst_34 = arith.constant dense<0.000000e+00> : vector<1xf32>
    %87 = vector.multi_reduction <add>, %86, %cst_34 [1, 2] : vector<1x16x1xf32> to vector<1xf32>
    %88 = vector.shape_cast %87 : vector<1xf32> to vector<1x1x1xf32>
    %89 = vector.extract %88[0, 0, 0] : f32 from vector<1x1x1xf32>
    %90 = vector.broadcast %89 : f32 to vector<1x1xf32>
    %91 = math.absf %56 : vector<16x1xf32>
    %92 = arith.addf %71, %78 : vector<16x1xf32>
    %93 = arith.mulf %91, %92 : vector<16x1xf32>
    %94 = vector.shape_cast %93 : vector<16x1xf32> to vector<1x16x1xf32>
    %cst_35 = arith.constant dense<0.000000e+00> : vector<1xf32>
    %95 = vector.multi_reduction <add>, %94, %cst_35 [1, 2] : vector<1x16x1xf32> to vector<1xf32>
    %96 = vector.shape_cast %95 : vector<1xf32> to vector<1x1x1xf32>
    %97 = vector.extract %96[0, 0, 0] : f32 from vector<1x1x1xf32>
    %98 = vector.broadcast %97 : f32 to vector<1x1xf32>
    %99 = tpu.iota {dimensions = array<i32: 1>} : vector<1x128xi32>
    %c0_i32_36 = arith.constant 0 : i32
    %100 = vector.broadcast %c0_i32_36 : i32 to vector<1x128xi32>
    %101 = arith.cmpi eq, %99, %100 : vector<1x128xi32>
    %cst_37 = arith.constant 0.000000e+00 : f32
    %102 = vector.shape_cast %84 : vector<1x1xf32> to vector<1x1xf32>
    %103 = vector.broadcast %102 : vector<1x1xf32> to vector<1x128xf32>
    %104 = vector.broadcast %cst_37 : f32 to vector<1x128xf32>
    %105 = arith.select %101, %103, %104 : vector<1x128xi1>, vector<1x128xf32>
    %c1_i32 = arith.constant 1 : i32
    %106 = vector.broadcast %c1_i32 : i32 to vector<1x128xi32>
    %107 = arith.cmpi eq, %99, %106 : vector<1x128xi32>
    %cst_38 = arith.constant 0.000000e+00 : f32
    %108 = vector.shape_cast %90 : vector<1x1xf32> to vector<1x1xf32>
    %109 = vector.broadcast %108 : vector<1x1xf32> to vector<1x128xf32>
    %110 = vector.broadcast %cst_38 : f32 to vector<1x128xf32>
    %111 = arith.select %107, %109, %110 : vector<1x128xi1>, vector<1x128xf32>
    %112 = arith.addf %105, %111 : vector<1x128xf32>
    %c2_i32 = arith.constant 2 : i32
    %113 = vector.broadcast %c2_i32 : i32 to vector<1x128xi32>
    %114 = arith.cmpi eq, %99, %113 : vector<1x128xi32>
    %cst_39 = arith.constant 0.000000e+00 : f32
    %115 = vector.shape_cast %98 : vector<1x1xf32> to vector<1x1xf32>
    %116 = vector.broadcast %115 : vector<1x1xf32> to vector<1x128xf32>
    %117 = vector.broadcast %cst_39 : f32 to vector<1x128xf32>
    %118 = arith.select %114, %116, %117 : vector<1x128xi1>, vector<1x128xf32>
    %119 = arith.addf %112, %118 : vector<1x128xf32>
    %c0_40 = arith.constant 0 : index
    %c0_41 = arith.constant 0 : index
    %120 = vector.load %arg5[%c0_40, %c0_41] : memref<1x128xf32, #tpu.memory_space<vmem>>, vector<1x128xf32>
    %121 = arith.addf %120, %119 : vector<1x128xf32>
    %c0_42 = arith.constant 0 : index
    %c0_43 = arith.constant 0 : index
    %122 = vector.load %arg5[%c0_42, %c0_43] : memref<1x128xf32, #tpu.memory_space<vmem>>, vector<1x128xf32>
    tpu.vector_store %arg5[%c0_42, %c0_43], %121 {strides = array<i32>} : memref<1x128xf32, #tpu.memory_space<vmem>>, vector<1x128xf32>,
    return
  }
  func.func @transform_0(%arg0: i32, %arg1: memref<2xi32, #tpu.memory_space<smem>>) -> (i32, i32) {
    %c0_i32 = arith.constant 0 : i32
    %c0_i32_0 = arith.constant 0 : i32
    return %arg0, %c0_i32 : i32, i32
  }
  func.func @transform_1(%arg0: i32, %arg1: memref<2xi32, #tpu.memory_space<smem>>) -> (i32, i32) {
    %c0_i32 = arith.constant 0 : i32
    %c0_i32_0 = arith.constant 0 : i32
    %c0_i32_1 = arith.constant 0 : i32
    return %c0_i32, %c0_i32_0 : i32, i32
  }
  func.func @transform_2(%arg0: i32, %arg1: memref<2xi32, #tpu.memory_space<smem>>) -> (i32, i32) {
    %c0_i32 = arith.constant 0 : i32
    %c0_i32_0 = arith.constant 0 : i32
    %c0_i32_1 = arith.constant 0 : i32
    return %c0_i32, %c0_i32_0 : i32, i32
  }
  func.func @transform_3(%arg0: i32, %arg1: memref<2xi32, #tpu.memory_space<smem>>) -> (i32, i32) {
    %c0_i32 = arith.constant 0 : i32
    %c0_i32_0 = arith.constant 0 : i32
    %c0_i32_1 = arith.constant 0 : i32
    return %c0_i32, %c0_i32_0 : i32, i32
  }
}

</mosaic_0001>

<bundles_post_ra>
// kernel: tpu_custom_call.1
= control target key start
LH: loop header
LB: loop body
LE: loop exit
PB: predicated region body
PF: predicated region fallthrough
CT: control target
= control target key end

     0   :  { %s744_s18 = smov [#allocation3]   ;;  %s806_s0 = inlined_call_operand.hbm [shape: s32[2], index: 0, kind: input, shape index: {}]   ;;  %s807_s1 = inlined_call_operand.hbm [shape: f32[16,16], index: 1, kind: input, shape index: {}]   ;;  %s808_s2 = inlined_call_operand.hbm [shape: f32[664,256], index: 2, kind: input, shape index: {}]   ;;  %s809_s3 = inlined_call_operand.hbm [shape: f32[8,256], index: 3, kind: input, shape index: {}]   ;;  %s810_s4 = inlined_call_operand.hbm [shape: f32[1,128], index: 4, kind: output, shape index: {}]  }
   0x1   :  { %s10_s17 = sshll.u32 %s806_s0, 4  ;;  %s11_s17 = int_to_ptr.hbm [resolvable:$true] %s10_s17 }
   0x2   :  { %13 = dma.hbm_to_smem %s11_s17, 16, %s744_s18, [#allocation2] }
   0x3   :  { %736 = dma.done.wait [#allocation2], 16 }
   0x4   :  { %737 = vsyncadd [#allocation2], 4294967280 }
   0x5   :  { %16 = sfence }
   0x6   :  { %17 = vsyncpa [#allocation5], 0 }
   0x7   :  { %18 = vsyncpa [#allocation8], 0  ;;  %s37_s21 = sshll.u32 %s808_s2, 4  ;;  %s38_s21 = int_to_ptr.hbm [resolvable:$true] %s37_s21 }
   0x8   :  { %19 = vsyncpa [#allocation6], 0  ;;  %s745_s22 = smov [#allocation7]   ;;  %s24_s0 = sshll.u32 %s807_s1, 4  ;;  %s25_s0 = int_to_ptr.hbm [resolvable:$true] %s24_s0 }
   0x9   :  { %s39_s23 = sshll.u32 %s745_s22, 4  ;;  %s746_s26 = smov 256   ;;  %s40_s23 = int_to_ptr.vmem [resolvable:$true] %s39_s23 }
   0xa   :  { %s747_s27 = smov 16   ;;  %s748_s28 = smov [#allocation4]  }
   0xb   :  { %45 = dma.hbm_to_vmem [thread:$0]  %s38_s21, 21248, %s40_s23, [#allocation8], %s746_s26, %s746_s26, %s747_s27  }
   0xc   :  { %s26_s29 = sshll.u32 %s748_s28, 4  ;;  %s749_s30 = smov 128   ;;  %s27_s29 = int_to_ptr.vmem [resolvable:$true] %s26_s29 }
   0xd   :  { %s750_s5 = smov 8   ;;  %s51_s7 = sshll.u32 %s809_s3, 4  ;;  %s52_s7 = int_to_ptr.hbm [resolvable:$true] %s51_s7 }
   0xe   :  { %32 = dma.hbm_to_vmem [thread:$0]  %s25_s0, 256, %s27_s29, [#allocation5], %s749_s30, %s749_s30, %s750_s5  }
   0xf   :  { %s751_s8 = smov [#allocation9]  }
  0x10   :  { %s53_s9 = sshll.u32 %s751_s8, 4  ;;  %s54_s9 = int_to_ptr.vmem [resolvable:$true] %s53_s9 }
  0x11   :  { %56 = dma.hbm_to_vmem [thread:$0]  %s52_s7, 256, %s54_s9, [#allocation8]  }
  0x12   :  { %738 = dma.done.wait [#allocation5], 256  }
  0x13   :  { %739 = vsyncadd [#allocation5], 4294967040 }
  0x14   :  { %740 = dma.done.wait [#allocation8], 21504  }
  0x15   :  { %741 = vsyncadd [#allocation8], 4294945792  ;;  %v84_v0 = vld [vmem:[#allocation7 + $0x10] sm:$0xff]  ;;  %v85_v1 = vld [vmem:[#allocation7 + $0x18] sm:$0xff]  ;;  %vm91_vm0 = vcmask 130048   ;;  %s485_s1 = sld [smem:[#allocation3]] }
  0x16   :  { %v82_v2 = vld [vmem:[#allocation7] sm:$0xff]  ;;  %112 = vmatpush.msra.mxu0 %v84_v0  ;;  %135 = vmatpush.msra.mxu1 %v85_v1  ;;  %v83_v3 = vld [vmem:[#allocation7 + $0x8] sm:$0xff]  ;;  %v74_v4 = vld [vmem:[#allocation4] sm:$0xff]  ;;  %s594_s3 = sld [smem:[#allocation3 + $0x1]]  ;;  %s753_s13 = smov [#allocation10]  }
  0x17   :  { %v186_v5 = vld [vmem:[#allocation7 + $0x110] sm:$0xff]  ;;  %v187_v7 = vld [vmem:[#allocation7 + $0x118] sm:$0xff]  ;;  %v184_v9 = vld [vmem:[#allocation7 + $0x100] sm:$0xff]  ;;  %s575_s14 = sshll.u32 %s753_s13, 4  ;;  %s577_s17 = sshll.u32 %s810_s4, 4  ;;  %s576_s14 = int_to_ptr.vmem [resolvable:$true] %s575_s14  ;;  %s578_s17 = int_to_ptr.hbm [resolvable:$true] %s577_s17 }
  0x18   :  { %v218_v6 = vld [vmem:[#allocation7 + $0x210] sm:$0xff]  ;;  %113 = vmatpush.msra.mxu0 %v82_v2  ;;  %136 = vmatpush.msra.mxu1 %v83_v3  ;;  %v219_v8 = vld [vmem:[#allocation7 + $0x218] sm:$0xff]  ;;  %v216_v10 = vld [vmem:[#allocation7 + $0x200] sm:$0xff] }
  0x19   :  { %588 = vmatmul.msk.f32.vlgmr.msra.gmra.mxu0 %vm91_vm0, %v74_v4  ;;  %590 = vmatmul.msk.f32.vlgmr.msra.gmra.mxu1 %vm91_vm0, %v74_v4  ;;  %v185_v11 = vld [vmem:[#allocation7 + $0x108] sm:$0xff]  ;;  %v182_v13 = vld [vmem:[#allocation7 + $0xf0] sm:$0xff]  ;;  %v183_v15 = vld [vmem:[#allocation7 + $0xf8] sm:$0xff] }
  0x1a   :  { %225 = vmatpush.msra.mxu2 %v186_v5  ;;  %248 = vmatpush.msra.mxu3 %v218_v6  ;;  %v217_v12 = vld [vmem:[#allocation7 + $0x208] sm:$0xff]  ;;  %v214_v14 = vld [vmem:[#allocation7 + $0x1f0] sm:$0xff]  ;;  %v215_v16 = vld [vmem:[#allocation7 + $0x1f8] sm:$0xff] }
  0x1b   :  { %271 = vmatpush.msrb.mxu0 %v187_v7  ;;  %294 = vmatpush.msrb.mxu1 %v219_v8  ;;  %v180_v17 = vld [vmem:[#allocation7 + $0xe0] sm:$0xff]  ;;  %v75_v19 = vld [vmem:[#allocation4 + $0x8] sm:$0xff]  ;;  %v181_v20 = vld [vmem:[#allocation7 + $0xe8] sm:$0xff] }
  0x1c   :  { %226 = vmatpush.msra.mxu2 %v184_v9  ;;  %249 = vmatpush.msra.mxu3 %v216_v10  ;;  %v212_v18 = vld [vmem:[#allocation7 + $0x1e0] sm:$0xff]  ;;  %v213_v21 = vld [vmem:[#allocation7 + $0x1e8] sm:$0xff]  ;;  %v178_v22 = vld [vmem:[#allocation7 + $0xd0] sm:$0xff] }
  0x1d   :  { %272 = vmatpush.msrb.mxu0 %v185_v11  ;;  %295 = vmatpush.msrb.mxu1 %v217_v12  ;;  %v210_v23 = vld [vmem:[#allocation7 + $0x1d0] sm:$0xff]  ;;  %v179_v24 = vld [vmem:[#allocation7 + $0xd8] sm:$0xff]  ;;  %v176_v26 = vld [vmem:[#allocation7 + $0xc0] sm:$0xff] }
  0x1e   :  { %227 = vmatpush.msra.mxu2 %v182_v13  ;;  %250 = vmatpush.msra.mxu3 %v214_v14  ;;  %v211_v25 = vld [vmem:[#allocation7 + $0x1d8] sm:$0xff]  ;;  %v208_v27 = vld [vmem:[#allocation7 + $0x1c0] sm:$0xff]  ;;  %v177_v28 = vld [vmem:[#allocation7 + $0xc8] sm:$0xff] }
  0x1f   :  { %273 = vmatpush.msrb.mxu0 %v183_v15  ;;  %296 = vmatpush.msrb.mxu1 %v215_v16  ;;  %v209_v29 = vld [vmem:[#allocation7 + $0x1c8] sm:$0xff]  ;;  %v174_v30 = vld [vmem:[#allocation7 + $0xb0] sm:$0xff]  ;;  %v175_v32 = vld [vmem:[#allocation7 + $0xb8] sm:$0xff] }
  0x20   :  { %228 = vmatpush.msra.mxu2 %v180_v17  ;;  %251 = vmatpush.msra.mxu3 %v212_v18  ;;  %v206_v31 = vld [vmem:[#allocation7 + $0x1b0] sm:$0xff]  ;;  %v207_v33 = vld [vmem:[#allocation7 + $0x1b8] sm:$0xff]  ;;  %v172_v34 = vld [vmem:[#allocation7 + $0xa0] sm:$0xff] }
  0x21   :  { %589 = vmatmul.msk.f32.gmra.mxu0 %vm91_vm0, %v75_v19  ;;  %591 = vmatmul.msk.f32.gmra.mxu1 %vm91_vm0, %v75_v19  ;;  %v204_v35 = vld [vmem:[#allocation7 + $0x1a0] sm:$0xff]  ;;  %v173_v36 = vld [vmem:[#allocation7 + $0xa8] sm:$0xff]  ;;  %v170_v38 = vld [vmem:[#allocation7 + $0x90] sm:$0xff] }
  0x22   :  { %274 = vmatpush.msrb.mxu0 %v181_v20  ;;  %297 = vmatpush.msrb.mxu1 %v213_v21  ;;  %v205_v37 = vld [vmem:[#allocation7 + $0x1a8] sm:$0xff]  ;;  %v202_v39 = vld [vmem:[#allocation7 + $0x190] sm:$0xff]  ;;  %v171_v40 = vld [vmem:[#allocation7 + $0x98] sm:$0xff] }
  0x23   :  { %229 = vmatpush.msra.mxu2 %v178_v22  ;;  %252 = vmatpush.msra.mxu3 %v210_v23  ;;  %v203_v41 = vld [vmem:[#allocation7 + $0x198] sm:$0xff]  ;;  %v168_v42 = vld [vmem:[#allocation7 + $0x80] sm:$0xff]  ;;  %v169_v44 = vld [vmem:[#allocation7 + $0x88] sm:$0xff] }
  0x24   :  { %275 = vmatpush.msrb.mxu0 %v179_v24  ;;  %298 = vmatpush.msrb.mxu1 %v211_v25  ;;  %v200_v43 = vld [vmem:[#allocation7 + $0x180] sm:$0xff]  ;;  %v201_v45 = vld [vmem:[#allocation7 + $0x188] sm:$0xff]  ;;  %v166_v46 = vld [vmem:[#allocation7 + $0x70] sm:$0xff] }
  0x25   :  { %230 = vmatpush.msra.mxu2 %v176_v26  ;;  %253 = vmatpush.msra.mxu3 %v208_v27  ;;  %v198_v47 = vld [vmem:[#allocation7 + $0x170] sm:$0xff]  ;;  %v167_v48 = vld [vmem:[#allocation7 + $0x78] sm:$0xff]  ;;  %v164_v50 = vld [vmem:[#allocation7 + $0x60] sm:$0xff] }
  0x26   :  { %276 = vmatpush.msrb.mxu0 %v177_v28  ;;  %299 = vmatpush.msrb.mxu1 %v209_v29  ;;  %v199_v49 = vld [vmem:[#allocation7 + $0x178] sm:$0xff]  ;;  %v196_v51 = vld [vmem:[#allocation7 + $0x160] sm:$0xff]  ;;  %v165_v52 = vld [vmem:[#allocation7 + $0x68] sm:$0xff] }
  0x27   :  { %231 = vmatpush.msra.mxu2 %v174_v30  ;;  %254 = vmatpush.msra.mxu3 %v206_v31  ;;  %v197_v53 = vld [vmem:[#allocation7 + $0x168] sm:$0xff]  ;;  %v162_v54 = vld [vmem:[#allocation7 + $0x50] sm:$0xff]  ;;  %v163_v56 = vld [vmem:[#allocation7 + $0x58] sm:$0xff] }
  0x28   :  { %277 = vmatpush.msrb.mxu0 %v175_v32  ;;  %300 = vmatpush.msrb.mxu1 %v207_v33  ;;  %v194_v55 = vld [vmem:[#allocation7 + $0x150] sm:$0xff]  ;;  %v195_v57 = vld [vmem:[#allocation7 + $0x158] sm:$0xff]  ;;  %v160_v58 = vld [vmem:[#allocation7 + $0x40] sm:$0xff] }
  0x29   :  { %232 = vmatpush.msra.mxu2 %v172_v34  ;;  %255 = vmatpush.msra.mxu3 %v204_v35  ;;  %v192_v59 = vld [vmem:[#allocation7 + $0x140] sm:$0xff]  ;;  %v161_v60 = vld [vmem:[#allocation7 + $0x48] sm:$0xff]  ;;  %v158_v62 = vld [vmem:[#allocation7 + $0x30] sm:$0xff] }
  0x2a   :  { %278 = vmatpush.msrb.mxu0 %v173_v36  ;;  %301 = vmatpush.msrb.mxu1 %v205_v37  ;;  %v193_v61 = vld [vmem:[#allocation7 + $0x148] sm:$0xff]  ;;  %v190_v63 = vld [vmem:[#allocation7 + $0x130] sm:$0xff]  ;;  %v159_v0 = vld [vmem:[#allocation7 + $0x38] sm:$0xff] }
  0x2b   :  { %233 = vmatpush.msra.mxu2 %v170_v38  ;;  %256 = vmatpush.msra.mxu3 %v202_v39  ;;  %v191_v1 = vld [vmem:[#allocation7 + $0x138] sm:$0xff]  ;;  %v156_v2 = vld [vmem:[#allocation7 + $0x20] sm:$0xff]  ;;  %v157_v4 = vld [vmem:[#allocation7 + $0x28] sm:$0xff] }
  0x2c   :  { %279 = vmatpush.msrb.mxu0 %v171_v40  ;;  %302 = vmatpush.msrb.mxu1 %v203_v41  ;;  %v188_v3 = vld [vmem:[#allocation7 + $0x120] sm:$0xff]  ;;  %v189_v5 = vld [vmem:[#allocation7 + $0x128] sm:$0xff]  ;;  %v360_v6 = vld [vmem:[#allocation7 + $0x410] sm:$0xff] }
  0x2d   :  { %234 = vmatpush.msra.mxu2 %v168_v42  ;;  %257 = vmatpush.msra.mxu3 %v200_v43  ;;  %v359_v7 = vld [vmem:[#allocation7 + $0x400] sm:$0xff]  ;;  %v344_v8 = vld [vmem:[#allocation7 + $0x310] sm:$0xff] }
  0x2e   :  { %280 = vmatpush.msrb.mxu0 %v169_v44  ;;  %303 = vmatpush.msrb.mxu1 %v201_v45  ;;  %v343_v9 = vld [vmem:[#allocation7 + $0x300] sm:$0xff]  ;;  %v358_v10 = vld [vmem:[#allocation7 + $0x3f0] sm:$0xff] }
  0x2f   :  { %235 = vmatpush.msra.mxu2 %v166_v46  ;;  %258 = vmatpush.msra.mxu3 %v198_v47  ;;  %v342_v11 = vld [vmem:[#allocation7 + $0x2f0] sm:$0xff]  ;;  %v357_v12 = vld [vmem:[#allocation7 + $0x3e0] sm:$0xff] }
  0x30   :  { %281 = vmatpush.msrb.mxu0 %v167_v48  ;;  %304 = vmatpush.msrb.mxu1 %v199_v49  ;;  %v341_v13 = vld [vmem:[#allocation7 + $0x2e0] sm:$0xff]  ;;  %v356_v14 = vld [vmem:[#allocation7 + $0x3d0] sm:$0xff] }
  0x31   :  { %236 = vmatpush.msra.mxu2 %v164_v50  ;;  %259 = vmatpush.msra.mxu3 %v196_v51  ;;  %v340_v15 = vld [vmem:[#allocation7 + $0x2d0] sm:$0xff]  ;;  %v355_v16 = vld [vmem:[#allocation7 + $0x3c0] sm:$0xff] }
  0x32   :  { %282 = vmatpush.msrb.mxu0 %v165_v52  ;;  %305 = vmatpush.msrb.mxu1 %v197_v53  ;;  %v339_v17 = vld [vmem:[#allocation7 + $0x2c0] sm:$0xff]  ;;  %v354_v18 = vld [vmem:[#allocation7 + $0x3b0] sm:$0xff] }
  0x33   :  { %237 = vmatpush.msra.mxu2 %v162_v54  ;;  %260 = vmatpush.msra.mxu3 %v194_v55  ;;  %v76_v19 = vld [vmem:[#allocation9] ss:$8 sm:$0x3]  ;;  %v353_v21 = vld [vmem:[#allocation7 + $0x3a0] sm:$0xff] }
  0x34   :  { %283 = vmatpush.msrb.mxu0 %v163_v56  ;;  %306 = vmatpush.msrb.mxu1 %v195_v57  ;;  %v338_v20 = vld [vmem:[#allocation7 + $0x2b0] sm:$0xff]  ;;  %v337_v22 = vld [vmem:[#allocation7 + $0x2a0] sm:$0xff]  ;;  %v87_v23 = vperm.slane %v76_v19, 0  ;;  %v88_v24 = vperm.slane %v76_v19, 1 }
  0x35   :  { %238 = vmatpush.msra.mxu2 %v160_v58  ;;  %261 = vmatpush.msra.mxu3 %v192_v59  ;;  %v352_v25 = vld [vmem:[#allocation7 + $0x390] sm:$0xff]  ;;  %v351_v27 = vld [vmem:[#allocation7 + $0x380] sm:$0xff] }
  0x36   :  { %284 = vmatpush.msrb.mxu0 %v161_v60  ;;  %307 = vmatpush.msrb.mxu1 %v193_v61  ;;  %v336_v26 = vld [vmem:[#allocation7 + $0x290] sm:$0xff]  ;;  %v349_v37 = vld [vmem:[#allocation7 + $0x360] sm:$0xff] }
  0x37   :  { %239 = vmatpush.msra.mxu2 %v158_v62  ;;  %262 = vmatpush.msra.mxu3 %v190_v63  ;;  %v350_v32 = vld [vmem:[#allocation7 + $0x370] sm:$0xff]  ;;  %v335_v46 = vld [vmem:[#allocation7 + $0x280] sm:$0xff] }
  0x38   :  { %285 = vmatpush.msrb.mxu0 %v159_v0  ;;  %308 = vmatpush.msrb.mxu1 %v191_v1  ;;  %v348_v47 = vld [vmem:[#allocation7 + $0x350] sm:$0xff]  ;;  %v347_v49 = vld [vmem:[#allocation7 + $0x340] sm:$0xff] }
  0x39   :  { %240 = vmatpush.msra.mxu2 %v156_v2  ;;  %263 = vmatpush.msra.mxu3 %v188_v3  ;;  %v334_v48 = vld [vmem:[#allocation7 + $0x270] sm:$0xff]  ;;  %v333_v50 = vld [vmem:[#allocation7 + $0x260] sm:$0xff] }
  0x3a   :  { %286 = vmatpush.msrb.mxu0 %v157_v4  ;;  %309 = vmatpush.msrb.mxu1 %v189_v5  ;;  %v346_v51 = vld [vmem:[#allocation7 + $0x330] sm:$0xff]  ;;  %v345_v53 = vld [vmem:[#allocation7 + $0x320] sm:$0xff] }
  0x3b   :  { %384 = vmatpush.msrb.mxu3 %v360_v6  ;;  %361 = vmatpush.msrb.mxu2 %v344_v8  ;;  %v332_v52 = vld [vmem:[#allocation7 + $0x250] sm:$0xff]  ;;  %v331_v54 = vld [vmem:[#allocation7 + $0x240] sm:$0xff] }
  0x3c   :  { %v330_v55 = vld [vmem:[#allocation7 + $0x230] sm:$0xff]  ;;  %v329_v56 = vld [vmem:[#allocation7 + $0x220] sm:$0xff] }
  0x3d   :  { %385 = vmatpush.msrb.mxu3 %v359_v7  ;;  %362 = vmatpush.msrb.mxu2 %v343_v9  ;;  %v428_v57 = vld [vmem:[#allocation7 + $0x510] sm:$0xff]  ;;  %v427_v58 = vld [vmem:[#allocation7 + $0x500] sm:$0xff] }
  0x3e   :  { %429 = vmatpush.msra.mxu0 %v428_v57  ;;  %596 = vmatpush.msra.mxu1 %v428_v57  ;;  %v426_v59 = vld [vmem:[#allocation7 + $0x4f0] sm:$0xff]  ;;  %v425_v60 = vld [vmem:[#allocation7 + $0x4e0] sm:$0xff] }
  0x3f   :  { %386 = vmatpush.msrb.mxu3 %v358_v10  ;;  %363 = vmatpush.msrb.mxu2 %v342_v11  ;;  %v78_v61 = vld [vmem:[#allocation9 + $0x1] ss:$8 sm:$0x3]  ;;  %v423_v0 = vld [vmem:[#allocation7 + $0x4c0] sm:$0xff] }
  0x40   :  { %430 = vmatpush.msra.mxu0 %v427_v58  ;;  %597 = vmatpush.msra.mxu1 %v427_v58  ;;  %v424_v62 = vld [vmem:[#allocation7 + $0x4d0] sm:$0xff]  ;;  %v222_v63 = vperm.slane %v78_v61, 1  ;;  %v421_v5 = vld [vmem:[#allocation7 + $0x4a0] sm:$0xff]  ;;  %v221_v6 = vperm.slane %v78_v61, 0  ;;  %v752_v61 = vmov 0.0  }
  0x41   :  { %387 = vmatpush.msrb.mxu3 %v357_v12  ;;  %364 = vmatpush.msrb.mxu2 %v341_v13  ;;  %v422_v1 = vld [vmem:[#allocation7 + $0x4b0] sm:$0xff]  ;;  %73 = vst [vmem:[#allocation10] sm:$0x1] %v752_v61 }
  0x42   :  { %431 = vmatpush.msra.mxu0 %v426_v59  ;;  %598 = vmatpush.msra.mxu1 %v426_v59  ;;  %v420_v8 = vld [vmem:[#allocation7 + $0x490] sm:$0xff] }
  0x43   :  { %388 = vmatpush.msrb.mxu3 %v356_v14  ;;  %365 = vmatpush.msrb.mxu2 %v340_v15 }
  0x44   :  { %432 = vmatpush.msra.mxu0 %v425_v60  ;;  %599 = vmatpush.msra.mxu1 %v425_v60 }
  0x45   :  { %389 = vmatpush.msrb.mxu3 %v355_v16  ;;  %366 = vmatpush.msrb.mxu2 %v339_v17 }
  0x46   :  { %433 = vmatpush.msra.mxu0 %v424_v62  ;;  %600 = vmatpush.msra.mxu1 %v424_v62  ;;  %v81_v62 = vld [vmem:[#allocation9 + $0x4] ss:$0 sm:$0xff] }
  0x47   :  { %390 = vmatpush.msrb.mxu3 %v354_v18  ;;  %367 = vmatpush.msrb.mxu2 %v338_v20 }
  0x48   :  { %434 = vmatpush.msra.mxu0 %v423_v0  ;;  %601 = vmatpush.msra.mxu1 %v423_v0 }
  0x49   :  { %391 = vmatpush.msrb.mxu3 %v353_v21  ;;  %368 = vmatpush.msrb.mxu2 %v337_v22 }
  0x4a   :  { %435 = vmatpush.msra.mxu0 %v422_v1  ;;  %602 = vmatpush.msra.mxu1 %v422_v1 }
  0x4b   :  { %392 = vmatpush.msrb.mxu3 %v352_v25  ;;  %369 = vmatpush.msrb.mxu2 %v336_v26 }
  0x4c   :  { %436 = vmatpush.msra.mxu0 %v421_v5  ;;  %603 = vmatpush.msra.mxu1 %v421_v5 }
  0x4d   :  { %393 = vmatpush.msrb.mxu3 %v351_v27  ;;  %370 = vmatpush.msrb.mxu2 %v335_v46 }
  0x4e   :  { %437 = vmatpush.msra.mxu0 %v420_v8  ;;  %604 = vmatpush.msra.mxu1 %v420_v8 }
  0x4f   :  { %394 = vmatpush.msrb.mxu3 %v350_v32  ;;  %371 = vmatpush.msrb.mxu2 %v334_v48  ;;  %v416_v32 = vld [vmem:[#allocation7 + $0x450] sm:$0xff] }
  0x51   :  { %395 = vmatpush.msrb.mxu3 %v349_v37  ;;  %372 = vmatpush.msrb.mxu2 %v333_v50 }
  0x53   :  { %396 = vmatpush.msrb.mxu3 %v348_v47  ;;  %373 = vmatpush.msrb.mxu2 %v332_v52 }
  0x55   :  { %397 = vmatpush.msrb.mxu3 %v347_v49  ;;  %374 = vmatpush.msrb.mxu2 %v331_v54  ;;  %v80_v49 = vld [vmem:[#allocation9 + $0x3] ss:$0 sm:$0xff] }
  0x57   :  { %398 = vmatpush.msrb.mxu3 %v346_v51  ;;  %375 = vmatpush.msrb.mxu2 %v330_v55 }
  0x59   :  { %399 = vmatpush.msrb.mxu3 %v345_v53  ;;  %376 = vmatpush.msrb.mxu2 %v329_v56  ;;  %v458_v53 = vld [vmem:[#allocation7 + $0x520] ss:$0 sm:$0xff] }
  0x96   :  { %v115_v28 = vpop.f32.mrf.mxu0  ;;  %v138_v29 = vpop.f32.mrf.mxu1 }
  0x97   :  { %v116_v30 = vadd.f32 %v115_v28, %v87_v23  ;;  %v139_v31 = vadd.f32 %v138_v29, %v88_v24  ;;  %v419_v29 = vld [vmem:[#allocation7 + $0x480] sm:$0xff] }
  0x98   :  { %438 = vmatpush.msra.mxu0 %v419_v29  ;;  %605 = vmatpush.msra.mxu1 %v419_v29 }
  0x99   :  { %vm144_vm1 = vcmp.gt.f32.partialorder %v116_v30, 0.0  ;;  %v148_v33 = vmul.f32 0.01, %v116_v30  ;;  %vm145_vm2 = vcmp.gt.f32.partialorder %v139_v31, 0.0  ;;  %v149_v34 = vmul.f32 0.01, %v139_v31 }
  0x9b   :  { %v152_v35 = vsel %vm144_vm1, %v116_v30, %v148_v33  ;;  %v153_v36 = vsel %vm145_vm2, %v139_v31, %v149_v34  ;;  %v418_v30 = vld [vmem:[#allocation7 + $0x470] sm:$0xff]  ;;  %v417_v31 = vld [vmem:[#allocation7 + $0x460] sm:$0xff]  ;;  %vm509_vm1 = vcmask 7168  }
  0x9c   :  { %241 = vmatmul.f32.vlgmr.msra.gmra.mxu2 %v152_v35  ;;  %264 = vmatmul.f32.vlgmr.msra.gmra.mxu3 %v153_v36  ;;  %v415_v33 = vld [vmem:[#allocation7 + $0x440] sm:$0xff]  ;;  %v414_v34 = vld [vmem:[#allocation7 + $0x430] sm:$0xff] }
  0x9d   :  { %287 = vmatmul.f32.vlgmr.msrb.gmra.mxu0 %v152_v35  ;;  %310 = vmatmul.f32.vlgmr.msrb.gmra.mxu1 %v153_v36  ;;  %v413_v35 = vld [vmem:[#allocation7 + $0x420] sm:$0xff]  ;;  %v79_v36 = vld [vmem:[#allocation9 + $0x2] ss:$0 sm:$0xff] }
  0x9e   :  { %v118_v38 = vpop.f32.mrf.mxu0  ;;  %v141_v39 = vpop.f32.mrf.mxu1  ;;  %439 = vmatpush.msra.mxu0 %v418_v30  ;;  %606 = vmatpush.msra.mxu1 %v418_v30 }
  0x9f   :  { %v119_v40 = vadd.f32 %v118_v38, %v87_v23  ;;  %v142_v41 = vadd.f32 %v141_v39, %v88_v24 }
  0xa0   :  { %440 = vmatpush.msra.mxu0 %v417_v31  ;;  %607 = vmatpush.msra.mxu1 %v417_v31 }
  0xa1   :  { %vm146_vm3 = vcmp.gt.f32.partialorder %v119_v40, 0.0  ;;  %v150_v42 = vmul.f32 0.01, %v119_v40  ;;  %vm147_vm4 = vcmp.gt.f32.partialorder %v142_v41, 0.0  ;;  %v151_v43 = vmul.f32 0.01, %v142_v41 }
  0xa2   :  { %441 = vmatpush.msra.mxu0 %v416_v32  ;;  %608 = vmatpush.msra.mxu1 %v416_v32 }
  0xa3   :  { %v154_v44 = vsel %vm146_vm3, %v119_v40, %v150_v42  ;;  %v155_v45 = vsel %vm147_vm4, %v142_v41, %v151_v43 }
  0xa4   :  { %244 = vmatmul.f32.gmra.mxu2 %v154_v44  ;;  %267 = vmatmul.f32.gmra.mxu3 %v155_v45 }
  0xa5   :  { %290 = vmatmul.f32.gmra.mxu0 %v154_v44  ;;  %313 = vmatmul.f32.gmra.mxu1 %v155_v45 }
  0xa6   :  { %442 = vmatpush.msra.mxu0 %v415_v33  ;;  %609 = vmatpush.msra.mxu1 %v415_v33 }
  0xa8   :  { %443 = vmatpush.msra.mxu0 %v414_v34  ;;  %610 = vmatpush.msra.mxu1 %v414_v34 }
  0xaa   :  { %444 = vmatpush.msra.mxu0 %v413_v35  ;;  %611 = vmatpush.msra.mxu1 %v413_v35 }
 0x11a   :  { %v288_v2 = vpop.f32.mrf.mxu0  ;;  %v311_v3 = vpop.f32.mrf.mxu1 }
 0x11b   :  { %v289_v4 = vadd.f32 %v288_v2, %v222_v63 }
 0x11d   :  { %v312_v7 = vadd.f32 %v311_v3, %v289_v4  ;;  %v486_v4 = vstv %s485_s1 }
 0x11f   :  { %v322_v9 = vmul.f32 0.01, %v312_v7  ;;  %v242_v10 = vpop.f32.mrf.mxu2  ;;  %v265_v11 = vpop.f32.mrf.mxu3  ;;  %vm318_vm5 = vcmp.gt.f32.partialorder %v312_v7, 0.0 }
 0x120   :  { %v243_v12 = vadd.f32 %v242_v10, %v221_v6 }
 0x121   :  { %v326_v13 = vsel %vm318_vm5, %v312_v7, %v322_v9  ;;  %v498_v9 = vstv %s594_s3 }
 0x122   :  { %v266_v14 = vadd.f32 %v265_v11, %v243_v12  ;;  %v291_v15 = vpop.f32.mrf.mxu0  ;;  %400 = vmatmul.f32.vlgmr.msrb.gmra.mxu3 %v326_v13  ;;  %v314_v18 = vpop.f32.mrf.mxu1 }
 0x123   :  { %v292_v16 = vadd.f32 %v291_v15, %v222_v63  ;;  %v473_v63 = vlaneseq }
 0x124   :  { %v321_v17 = vmul.f32 0.01, %v266_v14  ;;  %vm317_vm6 = vcmp.gt.f32.partialorder %v266_v14, 0.0 }
 0x125   :  { %v315_v19 = vadd.f32 %v314_v18, %v292_v16  ;;  %v474_v2 = vshrl.u32 %v473_v63, 7 }
 0x126   :  { %v325_v20 = vsel %vm317_vm6, %v266_v14, %v321_v17 }
 0x127   :  { %v245_v21 = vpop.f32.mrf.mxu2  ;;  %377 = vmatmul.f32.vlgmr.msrb.gmra.mxu2 %v325_v20  ;;  %vm320_vm7 = vcmp.gt.f32.partialorder %v315_v19, 0.0  ;;  %v324_v22 = vmul.f32 0.01, %v315_v19  ;;  %v268_v24 = vpop.f32.mrf.mxu3  ;;  %vm487_vm14 = vcmp.lt.s32.totalorder %v474_v2, %v486_v4  ;;  %vm500_vm0 = vcmp.lt.s32.totalorder %v474_v2, %v498_v9 }
 0x128   :  { %v246_v23 = vadd.f32 %v245_v21, %v221_v6  ;;  %v593_v8 = vsel %vm487_vm14, 1.0, %v752_v61  ;;  %v595_v17 = vsel %vm500_vm0, 1.0, %v752_v61 }
 0x129   :  { %v328_v25 = vsel %vm320_vm7, %v315_v19, %v324_v22 }
 0x12a   :  { %v269_v26 = vadd.f32 %v268_v24, %v246_v23  ;;  %403 = vmatmul.f32.gmra.mxu3 %v328_v25 }
 0x12c   :  { %vm319_vm8 = vcmp.gt.f32.partialorder %v269_v26, 0.0  ;;  %v323_v27 = vmul.f32 0.01, %v269_v26 }
 0x12e   :  { %v327_v28 = vsel %vm319_vm8, %v269_v26, %v323_v27 }
 0x12f   :  { %380 = vmatmul.f32.gmra.mxu2 %v327_v28 }
 0x1a5   :  { %v401_v37 = vpop.f32.mrf.mxu3 }
 0x1aa   :  { %v378_v38 = vpop.f32.mrf.mxu2 }
 0x1ab   :  { %v379_v39 = vadd.f32 %v378_v38, %v79_v36 }
 0x1ad   :  { %v402_v40 = vadd.f32 %v401_v37, %v379_v39  ;;  %v404_v45 = vpop.f32.mrf.mxu3 }
 0x1af   :  { %v409_v41 = vmul.f32 0.01, %v402_v40  ;;  %vm407_vm9 = vcmp.gt.f32.partialorder %v402_v40, 0.0 }
 0x1b1   :  { %v411_v42 = vsel %vm407_vm9, %v402_v40, %v409_v41 }
 0x1b2   :  { %v381_v43 = vpop.f32.mrf.mxu2  ;;  %445 = vmatmul.f32.vlgmr.msra.gmra.mxu0 %v411_v42 }
 0x1b3   :  { %v382_v44 = vadd.f32 %v381_v43, %v79_v36 }
 0x1b5   :  { %v405_v46 = vadd.f32 %v404_v45, %v382_v44 }
 0x1b7   :  { %v410_v47 = vmul.f32 0.01, %v405_v46  ;;  %vm408_vm10 = vcmp.gt.f32.partialorder %v405_v46, 0.0 }
 0x1b9   :  { %v412_v48 = vsel %vm408_vm10, %v405_v46, %v410_v47 }
 0x1ba   :  { %448 = vmatmul.f32.vlgmr.msra.gmra.mxu1 %v412_v48 }
 0x22f   :  { %v446_v50 = vpop.f32.mrf.mxu0 }
 0x230   :  { %v447_v51 = vadd.f32 %v446_v50, %v80_v49 }
 0x232   :  { %v454_v52 = vmul.f32 0.01, %v447_v51  ;;  %vm452_vm11 = vcmp.gt.f32.partialorder %v447_v51, 0.0 }
 0x234   :  { %v456_v54 = vsel %vm452_vm11, %v447_v51, %v454_v52  ;;  %v555_v51 = vand.u32 127, %v473_v63 }
 0x235   :  { %v459_v55 = vmul.f32 %v458_v53, %v456_v54 }
 0x236   :  { %vm556_vm2 = vcmp.eq.s32.totalorder %v555_v51, 0  ;;  %vm559_vm3 = vcmp.eq.s32.totalorder %v555_v51, 1  ;;  %vm563_vm4 = vcmp.eq.s32.totalorder %v555_v51, 2 }
 0x237   :  { %v449_v56 = vpop.f32.mrf.mxu1  ;;  %461 = vadd.xlane.f32.xlu0 %v459_v55 }
 0x238   :  { %v450_v57 = vadd.f32 %v449_v56, %v80_v49 }
 0x23a   :  { %v455_v58 = vmul.f32 0.01, %v450_v57  ;;  %vm453_vm12 = vcmp.gt.f32.partialorder %v450_v57, 0.0 }
 0x23c   :  { %v457_v59 = vsel %vm453_vm12, %v450_v57, %v455_v58 }
 0x23d   :  { %v460_v60 = vmul.f32 %v458_v53, %v457_v59  ;;  %v567_v59 = vld [vmem:[#allocation10] sm:$0x1] }
 0x23f   :  { %463 = vadd.xlane.f32.xlu0 %v460_v60 }
 0x2aa   :  { %v462_v0 = vpop.xlane.xlu0 %461 }
 0x2ab   :  { %v465_v1 = vadd.f32 %v462_v0, %v81_v62 }
 0x2ad   :  { %v469_v3 = vmul.f32 0.01, %v465_v1  ;;  %vm467_vm13 = vcmp.gt.f32.partialorder %v465_v1, 0.0 }
 0x2af   :  { %v471_v5 = vsel %vm467_vm13, %v465_v1, %v469_v3 }
 0x2b0   :  { %v536_v10 = vand.u32 2147483647, %v471_v5  ;;  %v507_v12 = vmul.f32 %v593_v8, %v471_v5  ;;  %v522_v26 = vmul.f32 0.0, %v471_v5 }
 0x2b2   :  { %v464_v6 = vpop.xlane.xlu0 %463  ;;  %v540_v16 = vmul.f32 %v593_v8, %v536_v10  ;;  %v510_v18 = vsel %vm509_vm1, %v507_v12, 0.0  ;;  %v524_v28 = vsel %vm509_vm1, %v522_v26, 0.0 }
 0x2b3   :  { %v466_v7 = vadd.f32 %v464_v6, %v81_v62 }
 0x2b4   :  { %v542_v22 = vsel %vm509_vm1, %v540_v16, 0.0 }
 0x2b5   :  { %vm468_vm15 = vcmp.gt.f32.partialorder %v466_v7, 0.0  ;;  %v470_v11 = vmul.f32 0.01, %v466_v7 }
 0x2b7   :  { %v472_v13 = vsel %vm468_vm15, %v466_v7, %v470_v11 }
 0x2b8   :  { %v508_v14 = vmul.f32 0.0, %v472_v13  ;;  %v537_v15 = vand.u32 2147483647, %v472_v13  ;;  %v523_v24 = vmul.f32 %v595_v17, %v472_v13 }
 0x2ba   :  { %v511_v19 = vsel %vm509_vm1, %v508_v14, 0.0  ;;  %v541_v20 = vmul.f32 %v595_v17, %v537_v15  ;;  %v525_v27 = vsel %vm509_vm1, %v523_v24, 0.0 }
 0x2bb   :  { %v512_v21 = vadd.f32 %v511_v19, %v510_v18  ;;  %v526_v29 = vadd.f32 %v525_v27, %v524_v28 }
 0x2bc   :  { %v543_v23 = vsel %vm509_vm1, %v541_v20, 0.0 }
 0x2bd   :  { %513 = vadd.xlane.f32.xlu1 %v512_v21  ;;  %v544_v25 = vadd.f32 %v543_v23, %v542_v22 }
 0x2bf   :  { %545 = vadd.xlane.f32.xlu2 %v544_v25 }
 0x2c5   :  { %527 = vadd.xlane.f32.xlu1 %v526_v29 }
 0x330   :  { %v514_v30 = vpop.xlane.xlu1 %513 }
 0x331   :  { %v515_v31 = vrot.slane %v514_v30, 4 }
 0x332   :  { %v546_v32 = vpop.xlane.xlu2 %545 }
 0x333   :  { %v516_v33 = vadd.f32 %v515_v31, %v514_v30  ;;  %v547_v34 = vrot.slane %v546_v32, 4 }
 0x335   :  { %v517_v35 = vrot.slane %v516_v33, 2  ;;  %v548_v36 = vadd.f32 %v547_v34, %v546_v32 }
 0x337   :  { %v518_v37 = vadd.f32 %v517_v35, %v516_v33  ;;  %v549_v38 = vrot.slane %v548_v36, 2 }
 0x338   :  { %v528_v39 = vpop.xlane.xlu1 %527 }
 0x339   :  { %v529_v40 = vrot.slane %v528_v39, 4  ;;  %v519_v41 = vrot.slane %v518_v37, 1  ;;  %v550_v44 = vadd.f32 %v549_v38, %v548_v36 }
 0x33b   :  { %v530_v42 = vadd.f32 %v529_v40, %v528_v39  ;;  %v520_v43 = vadd.f32 %v519_v41, %v518_v37  ;;  %v551_v47 = vrot.slane %v550_v44, 1 }
 0x33d   :  { %v531_v45 = vrot.slane %v530_v42, 2  ;;  %612 = vpush %v520_v43  ;;  %v552_v50 = vadd.f32 %v551_v47, %v550_v44 }
 0x33f   :  { %v532_v46 = vadd.f32 %v531_v45, %v530_v42 }
 0x341   :  { %v533_v48 = vrot.slane %v532_v46, 1 }
 0x343   :  { %v534_v49 = vadd.f32 %v533_v48, %v532_v46 }
 0x345   :  { %614 = vpush %v534_v49 }
 0x346   :  { %616 = vpush %v552_v50 }
 0x36e   :  { %s613_s10 = spop %612 }
 0x36f   :  { %v557_v52 = vstv %s613_s10 }
 0x370   :  { %v558_v54 = vsel %vm556_vm2, %v557_v52, 0.0 }
 0x376   :  { %s615_s11 = spop %614 }
 0x377   :  { %v560_v53 = vstv %s615_s11  ;;  %s617_s12 = spop %616 }
 0x378   :  { %v561_v55 = vsel %vm559_vm3, %v560_v53, 0.0  ;;  %v564_v56 = vstv %s617_s12 }
 0x379   :  { %v562_v57 = vadd.f32 %v561_v55, %v558_v54  ;;  %v565_v58 = vsel %vm563_vm4, %v564_v56, 0.0 }
 0x37b   :  { %v566_v60 = vadd.f32 %v565_v58, %v562_v57 }
 0x37d   :  { %v568_v61 = vadd.f32 %v567_v59, %v566_v60 }
 0x37f   :  { %569 = vst [vmem:[#allocation10] sm:$0x1] %v568_v61 }
 0x380   :  { %580 = dma.vmem_to_hbm [thread:$0]  %s576_s14, 16, %s578_s17, [#allocation6]  }
 0x381   :  { %742 = dma.done.wait [#allocation6], 16  }
 0x382   :  { %743 = vsyncadd [#allocation6], 4294967280 }
 0x383   :  { %585 = vsyncpa [#allocation5], 1 }
 0x384   :  { %586 = vsyncpa [#allocation8], 1 }
 0x385   :  { %587 = vsyncpa [#allocation6], 1 }

// kernel: tpu_custom_call.1
= control target key start
LH: loop header
LB: loop body
LE: loop exit
PB: predicated region body
PF: predicated region fallthrough
CT: control target
= control target key end

     0   :  { %s744_s18 = smov [#allocation3]   ;;  %s806_s0 = inlined_call_operand.hbm [shape: s32[2], index: 0, kind: input, shape index: {}]   ;;  %s807_s1 = inlined_call_operand.hbm [shape: f32[16,16], index: 1, kind: input, shape index: {}]   ;;  %s808_s2 = inlined_call_operand.hbm [shape: f32[664,256], index: 2, kind: input, shape index: {}]   ;;  %s809_s3 = inlined_call_operand.hbm [shape: f32[8,256], index: 3, kind: input, shape index: {}]   ;;  %s810_s4 = inlined_call_operand.hbm [shape: f32[1,128], index: 4, kind: output, shape index: {}]  }
   0x1   :  { %s10_s17 = sshll.u32 %s806_s0, 4  ;;  %s11_s17 = int_to_ptr.hbm [resolvable:$true] %s10_s17 }
   0x2   :  { %13 = dma.hbm_to_smem %s11_s17, 16, %s744_s18, [#allocation2] }
   0x3   :  { %736 = dma.done.wait [#allocation2], 16 }
   0x4   :  { %737 = vsyncadd [#allocation2], 4294967280 }
   0x5   :  { %16 = sfence }
   0x6   :  { %17 = vsyncpa [#allocation5], 0 }
   0x7   :  { %18 = vsyncpa [#allocation8], 0  ;;  %s37_s21 = sshll.u32 %s808_s2, 4  ;;  %s38_s21 = int_to_ptr.hbm [resolvable:$true] %s37_s21 }
   0x8   :  { %19 = vsyncpa [#allocation6], 0  ;;  %s745_s22 = smov [#allocation7]   ;;  %s24_s0 = sshll.u32 %s807_s1, 4  ;;  %s25_s0 = int_to_ptr.hbm [resolvable:$true] %s24_s0 }
   0x9   :  { %s39_s23 = sshll.u32 %s745_s22, 4  ;;  %s746_s26 = smov 256   ;;  %s40_s23 = int_to_ptr.vmem [resolvable:$true] %s39_s23 }
   0xa   :  { %s747_s27 = smov 16   ;;  %s748_s28 = smov [#allocation4]  }
   0xb   :  { %45 = dma.hbm_to_vmem [thread:$0]  %s38_s21, 21248, %s40_s23, [#allocation8], %s746_s26, %s746_s26, %s747_s27  }
   0xc   :  { %s26_s29 = sshll.u32 %s748_s28, 4  ;;  %s749_s30 = smov 128   ;;  %s27_s29 = int_to_ptr.vmem [resolvable:$true] %s26_s29 }
   0xd   :  { %s750_s5 = smov 8   ;;  %s51_s7 = sshll.u32 %s809_s3, 4  ;;  %s52_s7 = int_to_ptr.hbm [resolvable:$true] %s51_s7 }
   0xe   :  { %32 = dma.hbm_to_vmem [thread:$0]  %s25_s0, 256, %s27_s29, [#allocation5], %s749_s30, %s749_s30, %s750_s5  }
   0xf   :  { %s751_s8 = smov [#allocation9]  }
  0x10   :  { %s53_s9 = sshll.u32 %s751_s8, 4  ;;  %s54_s9 = int_to_ptr.vmem [resolvable:$true] %s53_s9 }
  0x11   :  { %56 = dma.hbm_to_vmem [thread:$0]  %s52_s7, 256, %s54_s9, [#allocation8]  }
  0x12   :  { %738 = dma.done.wait [#allocation5], 256  }
  0x13   :  { %739 = vsyncadd [#allocation5], 4294967040 }
  0x14   :  { %740 = dma.done.wait [#allocation8], 21504  }
  0x15   :  { %741 = vsyncadd [#allocation8], 4294945792  ;;  %v84_v0 = vld [vmem:[#allocation7 + $0x10] sm:$0xff]  ;;  %v85_v1 = vld [vmem:[#allocation7 + $0x18] sm:$0xff]  ;;  %vm91_vm0 = vcmask 130048   ;;  %s485_s1 = sld [smem:[#allocation3]] }
  0x16   :  { %v82_v2 = vld [vmem:[#allocation7] sm:$0xff]  ;;  %112 = vmatpush.msra.mxu0 %v84_v0  ;;  %135 = vmatpush.msra.mxu1 %v85_v1  ;;  %v83_v3 = vld [vmem:[#allocation7 + $0x8] sm:$0xff]  ;;  %v74_v4 = vld [vmem:[#allocation4] sm:$0xff]  ;;  %s594_s3 = sld [smem:[#allocation3 + $0x1]]  ;;  %s753_s13 = smov [#allocation10]  }
  0x17   :  { %v186_v5 = vld [vmem:[#allocation7 + $0x110] sm:$0xff]  ;;  %v187_v7 = vld [vmem:[#allocation7 + $0x118] sm:$0xff]  ;;  %v184_v9 = vld [vmem:[#allocation7 + $0x100] sm:$0xff]  ;;  %s575_s14 = sshll.u32 %s753_s13, 4  ;;  %s577_s17 = sshll.u32 %s810_s4, 4  ;;  %s576_s14 = int_to_ptr.vmem [resolvable:$true] %s575_s14  ;;  %s578_s17 = int_to_ptr.hbm [resolvable:$true] %s577_s17 }
  0x18   :  { %v218_v6 = vld [vmem:[#allocation7 + $0x210] sm:$0xff]  ;;  %113 = vmatpush.msra.mxu0 %v82_v2  ;;  %136 = vmatpush.msra.mxu1 %v83_v3  ;;  %v219_v8 = vld [vmem:[#allocation7 + $0x218] sm:$0xff]  ;;  %v216_v10 = vld [vmem:[#allocation7 + $0x200] sm:$0xff] }
  0x19   :  { %588 = vmatmul.msk.f32.vlgmr.msra.gmra.mxu0 %vm91_vm0, %v74_v4  ;;  %590 = vmatmul.msk.f32.vlgmr.msra.gmra.mxu1 %vm91_vm0, %v74_v4  ;;  %v185_v11 = vld [vmem:[#allocation7 + $0x108] sm:$0xff]  ;;  %v182_v13 = vld [vmem:[#allocation7 + $0xf0] sm:$0xff]  ;;  %v183_v15 = vld [vmem:[#allocation7 + $0xf8] sm:$0xff] }
  0x1a   :  { %225 = vmatpush.msra.mxu2 %v186_v5  ;;  %248 = vmatpush.msra.mxu3 %v218_v6  ;;  %v217_v12 = vld [vmem:[#allocation7 + $0x208] sm:$0xff]  ;;  %v214_v14 = vld [vmem:[#allocation7 + $0x1f0] sm:$0xff]  ;;  %v215_v16 = vld [vmem:[#allocation7 + $0x1f8] sm:$0xff] }
  0x1b   :  { %271 = vmatpush.msrb.mxu0 %v187_v7  ;;  %294 = vmatpush.msrb.mxu1 %v219_v8  ;;  %v180_v17 = vld [vmem:[#allocation7 + $0xe0] sm:$0xff]  ;;  %v75_v19 = vld [vmem:[#allocation4 + $0x8] sm:$0xff]  ;;  %v181_v20 = vld [vmem:[#allocation7 + $0xe8] sm:$0xff] }
  0x1c   :  { %226 = vmatpush.msra.mxu2 %v184_v9  ;;  %249 = vmatpush.msra.mxu3 %v216_v10  ;;  %v212_v18 = vld [vmem:[#allocation7 + $0x1e0] sm:$0xff]  ;;  %v213_v21 = vld [vmem:[#allocation7 + $0x1e8] sm:$0xff]  ;;  %v178_v22 = vld [vmem:[#allocation7 + $0xd0] sm:$0xff] }
  0x1d   :  { %272 = vmatpush.msrb.mxu0 %v185_v11  ;;  %295 = vmatpush.msrb.mxu1 %v217_v12  ;;  %v210_v23 = vld [vmem:[#allocation7 + $0x1d0] sm:$0xff]  ;;  %v179_v24 = vld [vmem:[#allocation7 + $0xd8] sm:$0xff]  ;;  %v176_v26 = vld [vmem:[#allocation7 + $0xc0] sm:$0xff] }
  0x1e   :  { %227 = vmatpush.msra.mxu2 %v182_v13  ;;  %250 = vmatpush.msra.mxu3 %v214_v14  ;;  %v211_v25 = vld [vmem:[#allocation7 + $0x1d8] sm:$0xff]  ;;  %v208_v27 = vld [vmem:[#allocation7 + $0x1c0] sm:$0xff]  ;;  %v177_v28 = vld [vmem:[#allocation7 + $0xc8] sm:$0xff] }
  0x1f   :  { %273 = vmatpush.msrb.mxu0 %v183_v15  ;;  %296 = vmatpush.msrb.mxu1 %v215_v16  ;;  %v209_v29 = vld [vmem:[#allocation7 + $0x1c8] sm:$0xff]  ;;  %v174_v30 = vld [vmem:[#allocation7 + $0xb0] sm:$0xff]  ;;  %v175_v32 = vld [vmem:[#allocation7 + $0xb8] sm:$0xff] }
  0x20   :  { %228 = vmatpush.msra.mxu2 %v180_v17  ;;  %251 = vmatpush.msra.mxu3 %v212_v18  ;;  %v206_v31 = vld [vmem:[#allocation7 + $0x1b0] sm:$0xff]  ;;  %v207_v33 = vld [vmem:[#allocation7 + $0x1b8] sm:$0xff]  ;;  %v172_v34 = vld [vmem:[#allocation7 + $0xa0] sm:$0xff] }
  0x21   :  { %589 = vmatmul.msk.f32.gmra.mxu0 %vm91_vm0, %v75_v19  ;;  %591 = vmatmul.msk.f32.gmra.mxu1 %vm91_vm0, %v75_v19  ;;  %v204_v35 = vld [vmem:[#allocation7 + $0x1a0] sm:$0xff]  ;;  %v173_v36 = vld [vmem:[#allocation7 + $0xa8] sm:$0xff]  ;;  %v170_v38 = vld [vmem:[#allocation7 + $0x90] sm:$0xff] }
  0x22   :  { %274 = vmatpush.msrb.mxu0 %v181_v20  ;;  %297 = vmatpush.msrb.mxu1 %v213_v21  ;;  %v205_v37 = vld [vmem:[#allocation7 + $0x1a8] sm:$0xff]  ;;  %v202_v39 = vld [vmem:[#allocation7 + $0x190] sm:$0xff]  ;;  %v171_v40 = vld [vmem:[#allocation7 + $0x98] sm:$0xff] }
  0x23   :  { %229 = vmatpush.msra.mxu2 %v178_v22  ;;  %252 = vmatpush.msra.mxu3 %v210_v23  ;;  %v203_v41 = vld [vmem:[#allocation7 + $0x198] sm:$0xff]  ;;  %v168_v42 = vld [vmem:[#allocation7 + $0x80] sm:$0xff]  ;;  %v169_v44 = vld [vmem:[#allocation7 + $0x88] sm:$0xff] }
  0x24   :  { %275 = vmatpush.msrb.mxu0 %v179_v24  ;;  %298 = vmatpush.msrb.mxu1 %v211_v25  ;;  %v200_v43 = vld [vmem:[#allocation7 + $0x180] sm:$0xff]  ;;  %v201_v45 = vld [vmem:[#allocation7 + $0x188] sm:$0xff]  ;;  %v166_v46 = vld [vmem:[#allocation7 + $0x70] sm:$0xff] }
  0x25   :  { %230 = vmatpush.msra.mxu2 %v176_v26  ;;  %253 = vmatpush.msra.mxu3 %v208_v27  ;;  %v198_v47 = vld [vmem:[#allocation7 + $0x170] sm:$0xff]  ;;  %v167_v48 = vld [vmem:[#allocation7 + $0x78] sm:$0xff]  ;;  %v164_v50 = vld [vmem:[#allocation7 + $0x60] sm:$0xff] }
  0x26   :  { %276 = vmatpush.msrb.mxu0 %v177_v28  ;;  %299 = vmatpush.msrb.mxu1 %v209_v29  ;;  %v199_v49 = vld [vmem:[#allocation7 + $0x178] sm:$0xff]  ;;  %v196_v51 = vld [vmem:[#allocation7 + $0x160] sm:$0xff]  ;;  %v165_v52 = vld [vmem:[#allocation7 + $0x68] sm:$0xff] }
  0x27   :  { %231 = vmatpush.msra.mxu2 %v174_v30  ;;  %254 = vmatpush.msra.mxu3 %v206_v31  ;;  %v197_v53 = vld [vmem:[#allocation7 + $0x168] sm:$0xff]  ;;  %v162_v54 = vld [vmem:[#allocation7 + $0x50] sm:$0xff]  ;;  %v163_v56 = vld [vmem:[#allocation7 + $0x58] sm:$0xff] }
  0x28   :  { %277 = vmatpush.msrb.mxu0 %v175_v32  ;;  %300 = vmatpush.msrb.mxu1 %v207_v33  ;;  %v194_v55 = vld [vmem:[#allocation7 + $0x150] sm:$0xff]  ;;  %v195_v57 = vld [vmem:[#allocation7 + $0x158] sm:$0xff]  ;;  %v160_v58 = vld [vmem:[#allocation7 + $0x40] sm:$0xff] }
  0x29   :  { %232 = vmatpush.msra.mxu2 %v172_v34  ;;  %255 = vmatpush.msra.mxu3 %v204_v35  ;;  %v192_v59 = vld [vmem:[#allocation7 + $0x140] sm:$0xff]  ;;  %v161_v60 = vld [vmem:[#allocation7 + $0x48] sm:$0xff]  ;;  %v158_v62 = vld [vmem:[#allocation7 + $0x30] sm:$0xff] }
  0x2a   :  { %278 = vmatpush.msrb.mxu0 %v173_v36  ;;  %301 = vmatpush.msrb.mxu1 %v205_v37  ;;  %v193_v61 = vld [vmem:[#allocation7 + $0x148] sm:$0xff]  ;;  %v190_v63 = vld [vmem:[#allocation7 + $0x130] sm:$0xff]  ;;  %v159_v0 = vld [vmem:[#allocation7 + $0x38] sm:$0xff] }
  0x2b   :  { %233 = vmatpush.msra.mxu2 %v170_v38  ;;  %256 = vmatpush.msra.mxu3 %v202_v39  ;;  %v191_v1 = vld [vmem:[#allocation7 + $0x138] sm:$0xff]  ;;  %v156_v2 = vld [vmem:[#allocation7 + $0x20] sm:$0xff]  ;;  %v157_v4 = vld [vmem:[#allocation7 + $0x28] sm:$0xff] }
  0x2c   :  { %279 = vmatpush.msrb.mxu0 %v171_v40  ;;  %302 = vmatpush.msrb.mxu1 %v203_v41  ;;  %v188_v3 = vld [vmem:[#allocation7 + $0x120] sm:$0xff]  ;;  %v189_v5 = vld [vmem:[#allocation7 + $0x128] sm:$0xff]  ;;  %v360_v6 = vld [vmem:[#allocation7 + $0x410] sm:$0xff] }
  0x2d   :  { %234 = vmatpush.msra.mxu2 %v168_v42  ;;  %257 = vmatpush.msra.mxu3 %v200_v43  ;;  %v359_v7 = vld [vmem:[#allocation7 + $0x400] sm:$0xff]  ;;  %v344_v8 = vld [vmem:[#allocation7 + $0x310] sm:$0xff] }
  0x2e   :  { %280 = vmatpush.msrb.mxu0 %v169_v44  ;;  %303 = vmatpush.msrb.mxu1 %v201_v45  ;;  %v343_v9 = vld [vmem:[#allocation7 + $0x300] sm:$0xff]  ;;  %v358_v10 = vld [vmem:[#allocation7 + $0x3f0] sm:$0xff] }
  0x2f   :  { %235 = vmatpush.msra.mxu2 %v166_v46  ;;  %258 = vmatpush.msra.mxu3 %v198_v47  ;;  %v342_v11 = vld [vmem:[#allocation7 + $0x2f0] sm:$0xff]  ;;  %v357_v12 = vld [vmem:[#allocation7 + $0x3e0] sm:$0xff] }
  0x30   :  { %281 = vmatpush.msrb.mxu0 %v167_v48  ;;  %304 = vmatpush.msrb.mxu1 %v199_v49  ;;  %v341_v13 = vld [vmem:[#allocation7 + $0x2e0] sm:$0xff]  ;;  %v356_v14 = vld [vmem:[#allocation7 + $0x3d0] sm:$0xff] }
  0x31   :  { %236 = vmatpush.msra.mxu2 %v164_v50  ;;  %259 = vmatpush.msra.mxu3 %v196_v51  ;;  %v340_v15 = vld [vmem:[#allocation7 + $0x2d0] sm:$0xff]  ;;  %v355_v16 = vld [vmem:[#allocation7 + $0x3c0] sm:$0xff] }
  0x32   :  { %282 = vmatpush.msrb.mxu0 %v165_v52  ;;  %305 = vmatpush.msrb.mxu1 %v197_v53  ;;  %v339_v17 = vld [vmem:[#allocation7 + $0x2c0] sm:$0xff]  ;;  %v354_v18 = vld [vmem:[#allocation7 + $0x3b0] sm:$0xff] }
  0x33   :  { %237 = vmatpush.msra.mxu2 %v162_v54  ;;  %260 = vmatpush.msra.mxu3 %v194_v55  ;;  %v76_v19 = vld [vmem:[#allocation9] ss:$8 sm:$0x3]  ;;  %v353_v21 = vld [vmem:[#allocation7 + $0x3a0] sm:$0xff] }
  0x34   :  { %283 = vmatpush.msrb.mxu0 %v163_v56  ;;  %306 = vmatpush.msrb.mxu1 %v195_v57  ;;  %v338_v20 = vld [vmem:[#allocation7 + $0x2b0] sm:$0xff]  ;;  %v337_v22 = vld [vmem:[#allocation7 + $0x2a0] sm:$0xff]  ;;  %v87_v23 = vperm.slane %v76_v19, 0  ;;  %v88_v24 = vperm.slane %v76_v19, 1 }
  0x35   :  { %238 = vmatpush.msra.mxu2 %v160_v58  ;;  %261 = vmatpush.msra.mxu3 %v192_v59  ;;  %v352_v25 = vld [vmem:[#allocation7 + $0x390] sm:$0xff]  ;;  %v351_v27 = vld [vmem:[#allocation7 + $0x380] sm:$0xff] }
  0x36   :  { %284 = vmatpush.msrb.mxu0 %v161_v60  ;;  %307 = vmatpush.msrb.mxu1 %v193_v61  ;;  %v336_v26 = vld [vmem:[#allocation7 + $0x290] sm:$0xff]  ;;  %v349_v37 = vld [vmem:[#allocation7 + $0x360] sm:$0xff] }
  0x37   :  { %239 = vmatpush.msra.mxu2 %v158_v62  ;;  %262 = vmatpush.msra.mxu3 %v190_v63  ;;  %v350_v32 = vld [vmem:[#allocation7 + $0x370] sm:$0xff]  ;;  %v335_v46 = vld [vmem:[#allocation7 + $0x280] sm:$0xff] }
  0x38   :  { %285 = vmatpush.msrb.mxu0 %v159_v0  ;;  %308 = vmatpush.msrb.mxu1 %v191_v1  ;;  %v348_v47 = vld [vmem:[#allocation7 + $0x350] sm:$0xff]  ;;  %v347_v49 = vld [vmem:[#allocation7 + $0x340] sm:$0xff] }
  0x39   :  { %240 = vmatpush.msra.mxu2 %v156_v2  ;;  %263 = vmatpush.msra.mxu3 %v188_v3  ;;  %v334_v48 = vld [vmem:[#allocation7 + $0x270] sm:$0xff]  ;;  %v333_v50 = vld [vmem:[#allocation7 + $0x260] sm:$0xff] }
  0x3a   :  { %286 = vmatpush.msrb.mxu0 %v157_v4  ;;  %309 = vmatpush.msrb.mxu1 %v189_v5  ;;  %v346_v51 = vld [vmem:[#allocation7 + $0x330] sm:$0xff]  ;;  %v345_v53 = vld [vmem:[#allocation7 + $0x320] sm:$0xff] }
  0x3b   :  { %384 = vmatpush.msrb.mxu3 %v360_v6  ;;  %361 = vmatpush.msrb.mxu2 %v344_v8  ;;  %v332_v52 = vld [vmem:[#allocation7 + $0x250] sm:$0xff]  ;;  %v331_v54 = vld [vmem:[#allocation7 + $0x240] sm:$0xff] }
  0x3c   :  { %v330_v55 = vld [vmem:[#allocation7 + $0x230] sm:$0xff]  ;;  %v329_v56 = vld [vmem:[#allocation7 + $0x220] sm:$0xff] }
  0x3d   :  { %385 = vmatpush.msrb.mxu3 %v359_v7  ;;  %362 = vmatpush.msrb.mxu2 %v343_v9  ;;  %v428_v57 = vld [vmem:[#allocation7 + $0x510] sm:$0xff]  ;;  %v427_v58 = vld [vmem:[#allocation7 + $0x500] sm:$0xff] }
  0x3e   :  { %429 = vmatpush.msra.mxu0 %v428_v57  ;;  %596 = vmatpush.msra.mxu1 %v428_v57  ;;  %v426_v59 = vld [vmem:[#allocation7 + $0x4f0] sm:$0xff]  ;;  %v425_v60 = vld [vmem:[#allocation7 + $0x4e0] sm:$0xff] }
  0x3f   :  { %386 = vmatpush.msrb.mxu3 %v358_v10  ;;  %363 = vmatpush.msrb.mxu2 %v342_v11  ;;  %v78_v61 = vld [vmem:[#allocation9 + $0x1] ss:$8 sm:$0x3]  ;;  %v423_v0 = vld [vmem:[#allocation7 + $0x4c0] sm:$0xff] }
  0x40   :  { %430 = vmatpush.msra.mxu0 %v427_v58  ;;  %597 = vmatpush.msra.mxu1 %v427_v58  ;;  %v424_v62 = vld [vmem:[#allocation7 + $0x4d0] sm:$0xff]  ;;  %v222_v63 = vperm.slane %v78_v61, 1  ;;  %v421_v5 = vld [vmem:[#allocation7 + $0x4a0] sm:$0xff]  ;;  %v221_v6 = vperm.slane %v78_v61, 0  ;;  %v752_v61 = vmov 0.0  }
  0x41   :  { %387 = vmatpush.msrb.mxu3 %v357_v12  ;;  %364 = vmatpush.msrb.mxu2 %v341_v13  ;;  %v422_v1 = vld [vmem:[#allocation7 + $0x4b0] sm:$0xff]  ;;  %73 = vst [vmem:[#allocation10] sm:$0x1] %v752_v61 }
  0x42   :  { %431 = vmatpush.msra.mxu0 %v426_v59  ;;  %598 = vmatpush.msra.mxu1 %v426_v59  ;;  %v420_v8 = vld [vmem:[#allocation7 + $0x490] sm:$0xff] }
  0x43   :  { %388 = vmatpush.msrb.mxu3 %v356_v14  ;;  %365 = vmatpush.msrb.mxu2 %v340_v15 }
  0x44   :  { %432 = vmatpush.msra.mxu0 %v425_v60  ;;  %599 = vmatpush.msra.mxu1 %v425_v60 }
  0x45   :  { %389 = vmatpush.msrb.mxu3 %v355_v16  ;;  %366 = vmatpush.msrb.mxu2 %v339_v17 }
  0x46   :  { %433 = vmatpush.msra.mxu0 %v424_v62  ;;  %600 = vmatpush.msra.mxu1 %v424_v62  ;;  %v81_v62 = vld [vmem:[#allocation9 + $0x4] ss:$0 sm:$0xff] }
  0x47   :  { %390 = vmatpush.msrb.mxu3 %v354_v18  ;;  %367 = vmatpush.msrb.mxu2 %v338_v20 }
  0x48   :  { %434 = vmatpush.msra.mxu0 %v423_v0  ;;  %601 = vmatpush.msra.mxu1 %v423_v0 }
  0x49   :  { %391 = vmatpush.msrb.mxu3 %v353_v21  ;;  %368 = vmatpush.msrb.mxu2 %v337_v22 }
  0x4a   :  { %435 = vmatpush.msra.mxu0 %v422_v1  ;;  %602 = vmatpush.msra.mxu1 %v422_v1 }
  0x4b   :  { %392 = vmatpush.msrb.mxu3 %v352_v25  ;;  %369 = vmatpush.msrb.mxu2 %v336_v26 }
  0x4c   :  { %436 = vmatpush.msra.mxu0 %v421_v5  ;;  %603 = vmatpush.msra.mxu1 %v421_v5 }
  0x4d   :  { %393 = vmatpush.msrb.mxu3 %v351_v27  ;;  %370 = vmatpush.msrb.mxu2 %v335_v46 }
  0x4e   :  { %437 = vmatpush.msra.mxu0 %v420_v8  ;;  %604 = vmatpush.msra.mxu1 %v420_v8 }
  0x4f   :  { %394 = vmatpush.msrb.mxu3 %v350_v32  ;;  %371 = vmatpush.msrb.mxu2 %v334_v48  ;;  %v416_v32 = vld [vmem:[#allocation7 + $0x450] sm:$0xff] }
  0x51   :  { %395 = vmatpush.msrb.mxu3 %v349_v37  ;;  %372 = vmatpush.msrb.mxu2 %v333_v50 }
  0x53   :  { %396 = vmatpush.msrb.mxu3 %v348_v47  ;;  %373 = vmatpush.msrb.mxu2 %v332_v52 }
  0x55   :  { %397 = vmatpush.msrb.mxu3 %v347_v49  ;;  %374 = vmatpush.msrb.mxu2 %v331_v54  ;;  %v80_v49 = vld [vmem:[#allocation9 + $0x3] ss:$0 sm:$0xff] }
  0x57   :  { %398 = vmatpush.msrb.mxu3 %v346_v51  ;;  %375 = vmatpush.msrb.mxu2 %v330_v55 }
  0x59   :  { %399 = vmatpush.msrb.mxu3 %v345_v53  ;;  %376 = vmatpush.msrb.mxu2 %v329_v56  ;;  %v458_v53 = vld [vmem:[#allocation7 + $0x520] ss:$0 sm:$0xff] }
  0x96   :  { %v115_v28 = vpop.f32.mrf.mxu0  ;;  %v138_v29 = vpop.f32.mrf.mxu1 }
  0x97   :  { %v116_v30 = vadd.f32 %v115_v28, %v87_v23  ;;  %v139_v31 = vadd.f32 %v138_v29, %v88_v24  ;;  %v419_v29 = vld [vmem:[#allocation7 + $0x480] sm:$0xff] }
  0x98   :  { %438 = vmatpush.msra.mxu0 %v419_v29  ;;  %605 = vmatpush.msra.mxu1 %v419_v29 }
  0x99   :  { %vm144_vm1 = vcmp.gt.f32.partialorder %v116_v30, 0.0  ;;  %v148_v33 = vmul.f32 0.01, %v116_v30  ;;  %vm145_vm2 = vcmp.gt.f32.partialorder %v139_v31, 0.0  ;;  %v149_v34 = vmul.f32 0.01, %v139_v31 }
  0x9b   :  { %v152_v35 = vsel %vm144_vm1, %v116_v30, %v148_v33  ;;  %v153_v36 = vsel %vm145_vm2, %v139_v31, %v149_v34  ;;  %v418_v30 = vld [vmem:[#allocation7 + $0x470] sm:$0xff]  ;;  %v417_v31 = vld [vmem:[#allocation7 + $0x460] sm:$0xff]  ;;  %vm509_vm1 = vcmask 7168  }
  0x9c   :  { %241 = vmatmul.f32.vlgmr.msra.gmra.mxu2 %v152_v35  ;;  %264 = vmatmul.f32.vlgmr.msra.gmra.mxu3 %v153_v36  ;;  %v415_v33 = vld [vmem:[#allocation7 + $0x440] sm:$0xff]  ;;  %v414_v34 = vld [vmem:[#allocation7 + $0x430] sm:$0xff] }
  0x9d   :  { %287 = vmatmul.f32.vlgmr.msrb.gmra.mxu0 %v152_v35  ;;  %310 = vmatmul.f32.vlgmr.msrb.gmra.mxu1 %v153_v36  ;;  %v413_v35 = vld [vmem:[#allocation7 + $0x420] sm:$0xff]  ;;  %v79_v36 = vld [vmem:[#allocation9 + $0x2] ss:$0 sm:$0xff] }
  0x9e   :  { %v118_v38 = vpop.f32.mrf.mxu0  ;;  %v141_v39 = vpop.f32.mrf.mxu1  ;;  %439 = vmatpush.msra.mxu0 %v418_v30  ;;  %606 = vmatpush.msra.mxu1 %v418_v30 }
  0x9f   :  { %v119_v40 = vadd.f32 %v118_v38, %v87_v23  ;;  %v142_v41 = vadd.f32 %v141_v39, %v88_v24 }
  0xa0   :  { %440 = vmatpush.msra.mxu0 %v417_v31  ;;  %607 = vmatpush.msra.mxu1 %v417_v31 }
  0xa1   :  { %vm146_vm3 = vcmp.gt.f32.partialorder %v119_v40, 0.0  ;;  %v150_v42 = vmul.f32 0.01, %v119_v40  ;;  %vm147_vm4 = vcmp.gt.f32.partialorder %v142_v41, 0.0  ;;  %v151_v43 = vmul.f32 0.01, %v142_v41 }
  0xa2   :  { %441 = vmatpush.msra.mxu0 %v416_v32  ;;  %608 = vmatpush.msra.mxu1 %v416_v32 }
  0xa3   :  { %v154_v44 = vsel %vm146_vm3, %v119_v40, %v150_v42  ;;  %v155_v45 = vsel %vm147_vm4, %v142_v41, %v151_v43 }
  0xa4   :  { %244 = vmatmul.f32.gmra.mxu2 %v154_v44  ;;  %267 = vmatmul.f32.gmra.mxu3 %v155_v45 }
  0xa5   :  { %290 = vmatmul.f32.gmra.mxu0 %v154_v44  ;;  %313 = vmatmul.f32.gmra.mxu1 %v155_v45 }
  0xa6   :  { %442 = vmatpush.msra.mxu0 %v415_v33  ;;  %609 = vmatpush.msra.mxu1 %v415_v33 }
  0xa8   :  { %443 = vmatpush.msra.mxu0 %v414_v34  ;;  %610 = vmatpush.msra.mxu1 %v414_v34 }
  0xaa   :  { %444 = vmatpush.msra.mxu0 %v413_v35  ;;  %611 = vmatpush.msra.mxu1 %v413_v35 }
 0x11a   :  { %v288_v2 = vpop.f32.mrf.mxu0  ;;  %v311_v3 = vpop.f32.mrf.mxu1 }
 0x11b   :  { %v289_v4 = vadd.f32 %v288_v2, %v222_v63 }
 0x11d   :  { %v312_v7 = vadd.f32 %v311_v3, %v289_v4  ;;  %v486_v4 = vstv %s485_s1 }
 0x11f   :  { %v322_v9 = vmul.f32 0.01, %v312_v7  ;;  %v242_v10 = vpop.f32.mrf.mxu2  ;;  %v265_v11 = vpop.f32.mrf.mxu3  ;;  %vm318_vm5 = vcmp.gt.f32.partialorder %v312_v7, 0.0 }
 0x120   :  { %v243_v12 = vadd.f32 %v242_v10, %v221_v6 }
 0x121   :  { %v326_v13 = vsel %vm318_vm5, %v312_v7, %v322_v9  ;;  %v498_v9 = vstv %s594_s3 }
 0x122   :  { %v266_v14 = vadd.f32 %v265_v11, %v243_v12  ;;  %v291_v15 = vpop.f32.mrf.mxu0  ;;  %400 = vmatmul.f32.vlgmr.msrb.gmra.mxu3 %v326_v13  ;;  %v314_v18 = vpop.f32.mrf.mxu1 }
 0x123   :  { %v292_v16 = vadd.f32 %v291_v15, %v222_v63  ;;  %v473_v63 = vlaneseq }
 0x124   :  { %v321_v17 = vmul.f32 0.01, %v266_v14  ;;  %vm317_vm6 = vcmp.gt.f32.partialorder %v266_v14, 0.0 }
 0x125   :  { %v315_v19 = vadd.f32 %v314_v18, %v292_v16  ;;  %v474_v2 = vshrl.u32 %v473_v63, 7 }
 0x126   :  { %v325_v20 = vsel %vm317_vm6, %v266_v14, %v321_v17 }
 0x127   :  { %v245_v21 = vpop.f32.mrf.mxu2  ;;  %377 = vmatmul.f32.vlgmr.msrb.gmra.mxu2 %v325_v20  ;;  %vm320_vm7 = vcmp.gt.f32.partialorder %v315_v19, 0.0  ;;  %v324_v22 = vmul.f32 0.01, %v315_v19  ;;  %v268_v24 = vpop.f32.mrf.mxu3  ;;  %vm487_vm14 = vcmp.lt.s32.totalorder %v474_v2, %v486_v4  ;;  %vm500_vm0 = vcmp.lt.s32.totalorder %v474_v2, %v498_v9 }
 0x128   :  { %v246_v23 = vadd.f32 %v245_v21, %v221_v6  ;;  %v593_v8 = vsel %vm487_vm14, 1.0, %v752_v61  ;;  %v595_v17 = vsel %vm500_vm0, 1.0, %v752_v61 }
 0x129   :  { %v328_v25 = vsel %vm320_vm7, %v315_v19, %v324_v22 }
 0x12a   :  { %v269_v26 = vadd.f32 %v268_v24, %v246_v23  ;;  %403 = vmatmul.f32.gmra.mxu3 %v328_v25 }
 0x12c   :  { %vm319_vm8 = vcmp.gt.f32.partialorder %v269_v26, 0.0  ;;  %v323_v27 = vmul.f32 0.01, %v269_v26 }
 0x12e   :  { %v327_v28 = vsel %vm319_vm8, %v269_v26, %v323_v27 }
 0x12f   :  { %380 = vmatmul.f32.gmra.mxu2 %v327_v28 }
 0x1a5   :  { %v401_v37 = vpop.f32.mrf.mxu3 }
 0x1aa   :  { %v378_v38 = vpop.f32.mrf.mxu2 }
 0x1ab   :  { %v379_v39 = vadd.f32 %v378_v38, %v79_v36 }
 0x1ad   :  { %v402_v40 = vadd.f32 %v401_v37, %v379_v39  ;;  %v404_v45 = vpop.f32.mrf.mxu3 }
 0x1af   :  { %v409_v41 = vmul.f32 0.01, %v402_v40  ;;  %vm407_vm9 = vcmp.gt.f32.partialorder %v402_v40, 0.0 }
 0x1b1   :  { %v411_v42 = vsel %vm407_vm9, %v402_v40, %v409_v41 }
 0x1b2   :  { %v381_v43 = vpop.f32.mrf.mxu2  ;;  %445 = vmatmul.f32.vlgmr.msra.gmra.mxu0 %v411_v42 }
 0x1b3   :  { %v382_v44 = vadd.f32 %v381_v43, %v79_v36 }
 0x1b5   :  { %v405_v46 = vadd.f32 %v404_v45, %v382_v44 }
 0x1b7   :  { %v410_v47 = vmul.f32 0.01, %v405_v46  ;;  %vm408_vm10 = vcmp.gt.f32.partialorder %v405_v46, 0.0 }
 0x1b9   :  { %v412_v48 = vsel %vm408_vm10, %v405_v46, %v410_v47 }
 0x1ba   :  { %448 = vmatmul.f32.vlgmr.msra.gmra.mxu1 %v412_v48 }
 0x22f   :  { %v446_v50 = vpop.f32.mrf.mxu0 }
 0x230   :  { %v447_v51 = vadd.f32 %v446_v50, %v80_v49 }
 0x232   :  { %v454_v52 = vmul.f32 0.01, %v447_v51  ;;  %vm452_vm11 = vcmp.gt.f32.partialorder %v447_v51, 0.0 }
 0x234   :  { %v456_v54 = vsel %vm452_vm11, %v447_v51, %v454_v52  ;;  %v555_v51 = vand.u32 127, %v473_v63 }
 0x235   :  { %v459_v55 = vmul.f32 %v458_v53, %v456_v54 }
 0x236   :  { %vm556_vm2 = vcmp.eq.s32.totalorder %v555_v51, 0  ;;  %vm559_vm3 = vcmp.eq.s32.totalorder %v555_v51, 1  ;;  %vm563_vm4 = vcmp.eq.s32.totalorder %v555_v51, 2 }
 0x237   :  { %v449_v56 = vpop.f32.mrf.mxu1  ;;  %461 = vadd.xlane.f32.xlu0 %v459_v55 }
 0x238   :  { %v450_v57 = vadd.f32 %v449_v56, %v80_v49 }
 0x23a   :  { %v455_v58 = vmul.f32 0.01, %v450_v57  ;;  %vm453_vm12 = vcmp.gt.f32.partialorder %v450_v57, 0.0 }
 0x23c   :  { %v457_v59 = vsel %vm453_vm12, %v450_v57, %v455_v58 }
 0x23d   :  { %v460_v60 = vmul.f32 %v458_v53, %v457_v59  ;;  %v567_v59 = vld [vmem:[#allocation10] sm:$0x1] }
 0x23f   :  { %463 = vadd.xlane.f32.xlu0 %v460_v60 }
 0x2aa   :  { %v462_v0 = vpop.xlane.xlu0 %461 }
 0x2ab   :  { %v465_v1 = vadd.f32 %v462_v0, %v81_v62 }
 0x2ad   :  { %v469_v3 = vmul.f32 0.01, %v465_v1  ;;  %vm467_vm13 = vcmp.gt.f32.partialorder %v465_v1, 0.0 }
 0x2af   :  { %v471_v5 = vsel %vm467_vm13, %v465_v1, %v469_v3 }
 0x2b0   :  { %v536_v10 = vand.u32 2147483647, %v471_v5  ;;  %v507_v12 = vmul.f32 %v593_v8, %v471_v5  ;;  %v522_v26 = vmul.f32 0.0, %v471_v5 }
 0x2b2   :  { %v464_v6 = vpop.xlane.xlu0 %463  ;;  %v540_v16 = vmul.f32 %v593_v8, %v536_v10  ;;  %v510_v18 = vsel %vm509_vm1, %v507_v12, 0.0  ;;  %v524_v28 = vsel %vm509_vm1, %v522_v26, 0.0 }
 0x2b3   :  { %v466_v7 = vadd.f32 %v464_v6, %v81_v62 }
 0x2b4   :  { %v542_v22 = vsel %vm509_vm1, %v540_v16, 0.0 }
 0x2b5   :  { %vm468_vm15 = vcmp.gt.f32.partialorder %v466_v7, 0.0  ;;  %v470_v11 = vmul.f32 0.01, %v466_v7 }
 0x2b7   :  { %v472_v13 = vsel %vm468_vm15, %v466_v7, %v470_v11 }
 0x2b8   :  { %v508_v14 = vmul.f32 0.0, %v472_v13  ;;  %v537_v15 = vand.u32 2147483647, %v472_v13  ;;  %v523_v24 = vmul.f32 %v595_v17, %v472_v13 }
 0x2ba   :  { %v511_v19 = vsel %vm509_vm1, %v508_v14, 0.0  ;;  %v541_v20 = vmul.f32 %v595_v17, %v537_v15  ;;  %v525_v27 = vsel %vm509_vm1, %v523_v24, 0.0 }
 0x2bb   :  { %v512_v21 = vadd.f32 %v511_v19, %v510_v18  ;;  %v526_v29 = vadd.f32 %v525_v27, %v524_v28 }
 0x2bc   :  { %v543_v23 = vsel %vm509_vm1, %v541_v20, 0.0 }
 0x2bd   :  { %513 = vadd.xlane.f32.xlu1 %v512_v21  ;;  %v544_v25 = vadd.f32 %v543_v23, %v542_v22 }
 0x2bf   :  { %545 = vadd.xlane.f32.xlu2 %v544_v25 }
 0x2c5   :  { %527 = vadd.xlane.f32.xlu1 %v526_v29 }
 0x330   :  { %v514_v30 = vpop.xlane.xlu1 %513 }
 0x331   :  { %v515_v31 = vrot.slane %v514_v30, 4 }
 0x332   :  { %v546_v32 = vpop.xlane.xlu2 %545 }
 0x333   :  { %v516_v33 = vadd.f32 %v515_v31, %v514_v30  ;;  %v547_v34 = vrot.slane %v546_v32, 4 }
 0x335   :  { %v517_v35 = vrot.slane %v516_v33, 2  ;;  %v548_v36 = vadd.f32 %v547_v34, %v546_v32 }
 0x337   :  { %v518_v37 = vadd.f32 %v517_v35, %v516_v33  ;;  %v549_v38 = vrot.slane %v548_v36, 2 }
 0x338   :  { %v528_v39 = vpop.xlane.xlu1 %527 }
 0x339   :  { %v529_v40 = vrot.slane %v528_v39, 4  ;;  %v519_v41 = vrot.slane %v518_v37, 1  ;;  %v550_v44 = vadd.f32 %v549_v38, %v548_v36 }
 0x33b   :  { %v530_v42 = vadd.f32 %v529_v40, %v528_v39  ;;  %v520_v43 = vadd.f32 %v519_v41, %v518_v37  ;;  %v551_v47 = vrot.slane %v550_v44, 1 }
 0x33d   :  { %v531_v45 = vrot.slane %v530_v42, 2  ;;  %612 = vpush %v520_v43  ;;  %v552_v50 = vadd.f32 %v551_v47, %v550_v44 }
 0x33f   :  { %v532_v46 = vadd.f32 %v531_v45, %v530_v42 }
 0x341   :  { %v533_v48 = vrot.slane %v532_v46, 1 }
 0x343   :  { %v534_v49 = vadd.f32 %v533_v48, %v532_v46 }
 0x345   :  { %614 = vpush %v534_v49 }
 0x346   :  { %616 = vpush %v552_v50 }
 0x36e   :  { %s613_s10 = spop %612 }
 0x36f   :  { %v557_v52 = vstv %s613_s10 }
 0x370   :  { %v558_v54 = vsel %vm556_vm2, %v557_v52, 0.0 }
 0x376   :  { %s615_s11 = spop %614 }
 0x377   :  { %v560_v53 = vstv %s615_s11  ;;  %s617_s12 = spop %616 }
 0x378   :  { %v561_v55 = vsel %vm559_vm3, %v560_v53, 0.0  ;;  %v564_v56 = vstv %s617_s12 }
 0x379   :  { %v562_v57 = vadd.f32 %v561_v55, %v558_v54  ;;  %v565_v58 = vsel %vm563_vm4, %v564_v56, 0.0 }
 0x37b   :  { %v566_v60 = vadd.f32 %v565_v58, %v562_v57 }
 0x37d   :  { %v568_v61 = vadd.f32 %v567_v59, %v566_v60 }
 0x37f   :  { %569 = vst [vmem:[#allocation10] sm:$0x1] %v568_v61 }
 0x380   :  { %580 = dma.vmem_to_hbm [thread:$0]  %s576_s14, 16, %s578_s17, [#allocation6]  }
 0x381   :  { %742 = dma.done.wait [#allocation6], 16  }
 0x382   :  { %743 = vsyncadd [#allocation6], 4294967280 }
 0x383   :  { %585 = vsyncpa [#allocation5], 1 }
 0x384   :  { %586 = vsyncpa [#allocation8], 1 }
 0x385   :  { %587 = vsyncpa [#allocation6], 1 }

</bundles_post_ra>
